<compile_context>
chip_gen: v7x
topology: tpu7x:2x2x1
jax: 0.10.0
libtpu: 0.0.40
codegen_flags: <defaults>
</compile_context>

<pallas_src>
import math

import jax
import jax.numpy as jnp
from jax.experimental import pallas as pl
from jax.experimental.pallas import tpu as pltpu

# ----------------------------- config ---------------------------------------
BATCH = 2            # args.train_batch_size
SEQ = 8
HIDDEN = 128         # config.hidden_size (lane-dense = 128)
NUM_HEADS = 2
HEAD_DIM = HIDDEN // NUM_HEADS
INTERMEDIATE = 256
NUM_LAYERS = 2
VOCAB = 100
MAX_POS = 16
NUM_FINE = 5         # classifier / classifier_test exist in the module but are
                     # unused by forward(), so they are omitted here.
NUM_COARSE = 3
CPAD = 128           # classifier logits padded to a lane-dense width
LAYER_NUM = 1        # args.layer_num (index into hidden_states); must be >= 1
                     # TODO(synk): LAYER_NUM == 0 (embedding output as shallow
                     # feature) not wired into the fused kernel.

TEMPERATURE = 0.07
ALPHA_SAME = 1.0
ALPHA_DIFF = 0.5
ALPHA_M = 1.0
GAMMA1 = 0.5
GAMMA2 = 0.1

LN_EPS = 1e-12
COS_EPS = 1e-8
PAD_NEG = -30000.0   # bias of padded classifier columns: exp(PAD_NEG - m) == 0

assert 1 <= LAYER_NUM <= NUM_LAYERS


# ----------------------------- helpers --------------------------------------
def _full_spec(shape):
    """Whole-array block, resident for every grid step."""
    zeros = (0,) * len(shape)
    return pl.BlockSpec(tuple(shape), lambda l, z=zeros: z)


def _layer_spec(shape):
    """Weights stacked on a leading (NUM_LAYERS,) axis; block = one layer."""
    tail = (0,) * (len(shape) - 1)
    return pl.BlockSpec((1,) + tuple(shape[1:]), lambda l, t=tail: (l,) + t)


def _layer_norm(x, g, b, eps=LN_EPS):
    mu = jnp.mean(x, axis=-1, keepdims=True)
    var = jnp.mean((x - mu) ** 2, axis=-1, keepdims=True)
    return (x - mu) * jax.lax.rsqrt(var + eps) * g + b


# ------------------------ in-kernel loss body --------------------------------
def _loss_body(ps, pd, neg, lblmask, onehot, logits_d, logits_s, out_shape):
    B = pd.shape[0]
    inv_t = 1.0 / TEMPERATURE

    nd_col = jnp.sqrt(jnp.sum(pd * pd, -1, keepdims=True))        # (B,1)
    ns_row = jnp.sqrt(jnp.sum(ps[None, :, :] ** 2, -1))           # (1,B)
    nd_row = jnp.sqrt(jnp.sum(pd[None, :, :] ** 2, -1))           # (1,B)
    nn_mat = jnp.sqrt(jnp.sum(neg * neg, -1))                     # (B,Bq)

    # cosine-similarity numerators (B x B on the MXU, momentum dots on the VPU)
    dots_ds = jax.lax.dot_general(pd, ps, (((1,), (1,)), ((), ())),
                                  preferred_element_type=jnp.float32)
    dots_dd = jax.lax.dot_general(pd, pd, (((1,), (1,)), ((), ())),
                                  preferred_element_type=jnp.float32)
    dots_dm = jnp.sum(pd[:, None, :] * neg, -1)                   # (B,Bq)

    # exact divides here: approx-reciprocal error would be amplified by 1/T
    logits_shallow = dots_ds / jnp.maximum(nd_col * ns_row, COS_EPS) * inv_t
    logits_deep = dots_dd / jnp.maximum(nd_col * nd_row, COS_EPS) * inv_t
    logits_mom = dots_dm / jnp.maximum(nd_col * nn_mat, COS_EPS) * inv_t

    rows = jax.lax.broadcasted_iota(jnp.int32, (B, B), 0)
    cols = jax.lax.broadcasted_iota(jnp.int32, (B, B), 1)
    eye = (rows == cols).astype(jnp.float32)
    mask_w = (ALPHA_SAME - ALPHA_DIFF) * lblmask + ALPHA_DIFF - eye

    exp_s = jnp.exp(logits_shallow) * mask_w
    exp_d = jnp.exp(logits_deep) * mask_w
    exp_m = jnp.exp(logits_mom) * ALPHA_M

    log_prob = (logits_shallow
                - jnp.log(jnp.sum(exp_s, 1, keepdims=True) + 1e-12)
                - jnp.log(jnp.sum(exp_d, 1, keepdims=True) + 1e-12)
                - jnp.log(jnp.sum(exp_m, 1, keepdims=True) + 1e-12))
    mean_log_prob_pos = jnp.sum(log_prob * eye, 1, keepdims=True)  # (B,1)
    contrastive = jnp.mean(-mean_log_prob_pos)

    def ce(logits):
        m = jnp.max(logits, -1, keepdims=True)
        lse = jnp.log(jnp.sum(jnp.exp(logits - m), -1, keepdims=True)) + m
        nll = lse - jnp.sum(onehot * logits, -1, keepdims=True)
        return jnp.mean(nll)

    loss_deep = ce(logits_d)        # CE(classifier_coarse(pool_d), labels)
    loss_coarse = ce(logits_s)      # CE(classifier_coarse(pool_s), labels)
    total = loss_deep + GAMMA1 * loss_coarse + GAMMA2 * contrastive
    return jnp.zeros(out_shape, jnp.float32) + total               # 128-wide slab


# ------------------ Pallas kernel: fused BERT forward ------------------------
def make_model_kernel(train):
    def kernel(*refs):
        if train:
            (x_ref, bias_ref,
             wqkv_ref, bqkv_ref, wo_ref, bo_ref,
             ln1g_ref, ln1b_ref, w1_ref, b1_ref, w2_ref, b2_ref,
             ln2g_ref, ln2b_ref,
             embg_ref, embb_ref, dw_ref, db_ref, cw_ref, cb_ref,
             neg_ref, lblmask_ref, onehot_ref,
             loss_ref,
             carry_ref, pool_s_ref) = refs
        else:
            (x_ref, bias_ref,
             wqkv_ref, bqkv_ref, wo_ref, bo_ref,
             ln1g_ref, ln1b_ref, w1_ref, b1_ref, w2_ref, b2_ref,
             ln2g_ref, ln2b_ref,
             embg_ref, embb_ref, dw_ref, db_ref,
             pool_d_ref,
             carry_ref) = refs

        lid = pl.program_id(0)                      # layer index
        B, S, H = carry_ref.shape

        # Embedding LayerNorm folded into the first grid step; activation is
        # carried across layers in VMEM scratch (never round-trips to HBM).
        @pl.when(lid == 0)
        def _():
            carry_ref[...] = _layer_norm(x_ref[...], embg_ref[...], embb_ref[...])

        x2d = carry_ref[...].reshape(B * S, H)      # f32

        # ---- fused QKV projection: one MXU push, bf16 operands, f32 accum --
        qkv = jnp.dot(x2d.astype(jnp.bfloat16), wqkv_ref[0],
                      preferred_element_type=jnp.float32) + bqkv_ref[0]
        # 128-lane-aligned column groups only (no 64-wide slices anywhere)
        q = qkv[:, 0 * H:1 * H].reshape(B, S, H)
        k = qkv[:, 1 * H:2 * H].reshape(B, S, H)
        v = qkv[:, 2 * H:3 * H].reshape(B, S, H)

        # ---- multi-head attention via per-head lane masks -------------------
        # Per-head scores use a 0/1 mask on Q lanes (full 128-lane contraction,
        # mathematically identical to slicing head columns); per-head context
        # uses the same mask on V so contributions land in disjoint lane
        # groups and the plain sum reconstructs the concatenated context — no
        # cross-lane shuffles or concatenates.
        scale = 1.0 / math.sqrt(HEAD_DIM)
        bias = bias_ref[...]                        # (B,1,S) broadcast add
        lane = jax.lax.broadcasted_iota(jnp.int32, (1, 1, H), 2)
        ctx = jnp.zeros((B, S, H), jnp.float32)
        for h in range(NUM_HEADS):
            hmask = jnp.logical_and(lane >= h * HEAD_DIM,
                                    lane < (h + 1) * HEAD_DIM).astype(jnp.float32)
            scores = jnp.einsum('bqd,bkd->bqk',
                                (q * hmask).astype(jnp.bfloat16),
                                k.astype(jnp.bfloat16),
                                preferred_element_type=jnp.float32) * scale + bias
            m = jnp.max(scores, axis=-1, keepdims=True)
            p = jnp.exp(scores - m)
            p = p * pl.reciprocal(jnp.sum(p, axis=-1, keepdims=True), approx=True)
            ctx = ctx + jnp.einsum('bqk,bkd->bqd',
                                   p.astype(jnp.bfloat16),
                                   (v * hmask).astype(jnp.bfloat16),
                                   preferred_element_type=jnp.float32)

        attn_out = jnp.dot(ctx.reshape(B * S, H).astype(jnp.bfloat16), wo_ref[0],
                           preferred_element_type=jnp.float32) + bo_ref[0]
        h1 = _layer_norm(x2d + attn_out, ln1g_ref[0], ln1b_ref[0])

        # TODO(synk): HF BertModel uses exact erf GELU; tanh approximation here.
        ff = jax.nn.gelu(jnp.dot(h1.astype(jnp.bfloat16), w1_ref[0],
                                 preferred_element_type=jnp.float32) + b1_ref[0],
                         approximate=True)
        ff = jnp.dot(ff.astype(jnp.bfloat16), w2_ref[0],
                     preferred_element_type=jnp.float32) + b2_ref[0]
        h2 = _layer_norm(h1 + ff, ln2g_ref[0], ln2b_ref[0])
        carry_ref[...] = h2.reshape(B, S, H)

        # ---- fused pooling head (mean over seq -> dense -> tanh) ------------
        # TODO(synk): dropout is identity here (eval semantics); train-mode
        # dropout would use pltpu.prng_seed / pltpu.stateful_bernoulli.
        def pool(h_2d):
            mean = jnp.mean(h_2d.reshape(B, S, H), axis=1)          # (B,H)
            return jnp.tanh(jnp.dot(mean.astype(jnp.bfloat16), dw_ref[...],
                                    preferred_element_type=jnp.float32)
                            + db_ref[...])

        if train:
            @pl.when(lid == LAYER_NUM - 1)          # shallow pooled feature
            def _():
                pool_s_ref[...] = pool(h2)

            @pl.when(lid == NUM_LAYERS - 1)         # deep feature + loss
            def _():
                pd = pool(h2)
                ps = pool_s_ref[...]
                logits_d = jnp.dot(pd.astype(jnp.bfloat16), cw_ref[...],
                                   preferred_element_type=jnp.float32) + cb_ref[...]
                logits_s = jnp.dot(ps.astype(jnp.bfloat16), cw_ref[...],
                                   preferred_element_type=jnp.float32) + cb_ref[...]
                loss_ref[...] = _loss_body(ps, pd, neg_ref[...], lblmask_ref[...],
                                           onehot_ref[...], logits_d, logits_s,
                                           loss_ref.shape)
        else:
            @pl.when(lid == NUM_LAYERS - 1)
            def _():
                pool_d_ref[...] = pool(h2)

    return kernel


# ------------------------------- JAX glue ------------------------------------
_LAYER_WEIGHT_NAMES = ('wqkv', 'bqkv', 'wo', 'bo', 'ln1_g', 'ln1_b',
                       'w1', 'b1', 'w2', 'b2', 'ln2_g', 'ln2_b')
_HEAD_WEIGHT_NAMES = ('emb_ln_g', 'emb_ln_b', 'dense_w', 'dense_b')


def _common_args_and_specs(params, emb_sum, attn_bias):
    args = [emb_sum, attn_bias]
    specs = [_full_spec(emb_sum.shape), _full_spec(attn_bias.shape)]
    for name in _LAYER_WEIGHT_NAMES:
        args.append(params[name])
        specs.append(_layer_spec(params[name].shape))
    for name in _HEAD_WEIGHT_NAMES:
        args.append(params[name])
        specs.append(_full_spec(params[name].shape))
    return args, specs


def run_model(params, emb_sum, attn_bias, train, negative=None, lblmask=None,
              onehot=None):
    B, S, H = emb_sum.shape
    args, in_specs = _common_args_and_specs(params, emb_sum, attn_bias)
    scratch = [pltpu.VMEM((B, S, H), jnp.float32)]                  # layer carry

    if train:
        for a in (params['clf_w'], params['clf_b'], negative, lblmask, onehot):
            args.append(a)
            in_specs.append(_full_spec(a.shape))
        scratch.append(pltpu.VMEM((B, H), jnp.float32))             # shallow pool
        out_shape = jax.ShapeDtypeStruct((1, CPAD), jnp.float32)
        out_spec = pl.BlockSpec((1, CPAD), lambda l: (0, 0))
    else:
        out_shape = jax.ShapeDtypeStruct((B, H), jnp.float32)
        out_spec = pl.BlockSpec((B, H), lambda l: (0, 0))

    return pl.pallas_call(
        make_model_kernel(train),
        out_shape=out_shape,
        grid=(NUM_LAYERS,),
        in_specs=in_specs,
        out_specs=out_spec,
        scratch_shapes=scratch,
        compiler_params=pltpu.CompilerParams(
            dimension_semantics=("arbitrary",)),
    )(*args)


def init_params(key):
    def nrm(k, shape):
        return 0.02 * jax.random.normal(k, shape, jnp.float32)

    ks = jax.random.split(key, 9)
    L, H = NUM_LAYERS, HIDDEN
    clf_w = jnp.pad(nrm(ks[4], (H, NUM_COARSE)),
                    ((0, 0), (0, CPAD - NUM_COARSE)))
    clf_b = jnp.full((1, CPAD), PAD_NEG, jnp.float32).at[0, :NUM_COARSE].set(0.0)
    return {
        'word_emb': nrm(ks[0], (VOCAB, H)),
        'pos_emb': nrm(ks[1], (MAX_POS, H)),
        'type_emb': nrm(ks[2], (2, H)),
        'emb_ln_g': jnp.ones((1, H), jnp.float32),
        'emb_ln_b': jnp.zeros((1, H), jnp.float32),
        'dense_w': nrm(ks[3], (H, H)).astype(jnp.bfloat16),
        'dense_b': jnp.zeros((1, H), jnp.float32),
        'clf_w': clf_w.astype(jnp.bfloat16),
        'clf_b': clf_b,
        # per-layer weights stacked along a leading (NUM_LAYERS,) axis
        'wqkv': nrm(ks[5], (L, H, 3 * H)).astype(jnp.bfloat16),
        'bqkv': jnp.zeros((L, 1, 3 * H), jnp.float32),
        'wo': nrm(ks[6], (L, H, H)).astype(jnp.bfloat16),
        'bo': jnp.zeros((L, 1, H), jnp.float32),
        'ln1_g': jnp.ones((L, 1, H), jnp.float32),
        'ln1_b': jnp.zeros((L, 1, H), jnp.float32),
        'w1': nrm(ks[7], (L, H, INTERMEDIATE)).astype(jnp.bfloat16),
        'b1': jnp.zeros((L, 1, INTERMEDIATE), jnp.float32),
        'w2': nrm(ks[8], (L, INTERMEDIATE, H)).astype(jnp.bfloat16),
        'b2': jnp.zeros((L, 1, H), jnp.float32),
        'ln2_g': jnp.ones((L, 1, H), jnp.float32),
        'ln2_b': jnp.zeros((L, 1, H), jnp.float32),
    }


def embed_sum(p, input_ids, token_type_ids):
    """word + position + type embeddings; LayerNorm happens inside the kernel."""
    we = p['word_emb'][input_ids]
    pe = p['pos_emb'][:input_ids.shape[1]][None]
    te = p['type_emb'][token_type_ids]
    return we + pe + te


def query_queue(queue, labels):
    # temp_queue[i] = queue[labels[i]]
    return queue[labels]


def update_queue(queue, feats, labels):
    # queue[label] <- concat(queue[label][1:], feats[i]) sequentially, jit-safe.
    def body(i, q):
        lbl = labels[i]
        row = jax.lax.dynamic_index_in_dim(q, lbl, axis=0, keepdims=False)
        new_row = jnp.concatenate([row[1:], feats[i][None, :]], axis=0)
        return jax.lax.dynamic_update_index_in_dim(q, new_row, lbl, axis=0)
    return jax.lax.fori_loop(0, labels.shape[0], body, queue)


def bert_for_model_forward(params, queue, input_ids, token_type_ids,
                           attention_mask, labels=None, mode=None, k=None):
    emb = embed_sum(params, input_ids, token_type_ids)
    attn_bias = (1.0 - attention_mask.astype(jnp.float32))[:, None, :] * -10000.0

    if mode == 'train':
        negative = query_queue(queue, labels)
        lblmask = (labels[:, None] == labels[None, :]).astype(jnp.float32)
        onehot = jax.nn.one_hot(labels, CPAD, dtype=jnp.float32)
        loss_slab = run_model(params, emb, attn_bias, True,
                              negative=negative, lblmask=lblmask, onehot=onehot)
        new_queue = update_queue(queue, k, labels)
        return loss_slab[0, 0], new_queue
    elif mode == 'extract':
        return run_model(params, emb, attn_bias, False)


# --------------------------------- main --------------------------------------
if __name__ == "__main__":
    root = jax.random.PRNGKey(0)
    k_param, k_ids, k_lab, k_feat = jax.random.split(root, 4)

    params = init_params(k_param)
    queue = jnp.zeros((NUM_COARSE, BATCH, HIDDEN), jnp.float32)

    input_ids = jax.random.randint(k_ids, (BATCH, SEQ), 0, VOCAB, dtype=jnp.int32)
    token_type_ids = jnp.zeros((BATCH, SEQ), jnp.int32)
    attention_mask = jnp.ones((BATCH, SEQ), jnp.float32)
    labels = jax.random.randint(k_lab, (BATCH,), 0, NUM_COARSE, dtype=jnp.int32)
    k_feats = jax.random.normal(k_feat, (BATCH, HIDDEN), jnp.float32)

    fwd = jax.jit(bert_for_model_forward, static_argnames=('mode',))

    pool_d = fwd(params, queue, input_ids, token_type_ids, attention_mask,
                 labels=None, mode='extract', k=None)
    loss, new_queue = fwd(params, queue, input_ids, token_type_ids,
                          attention_mask, labels=labels, mode='train',
                          k=k_feats)
    jax.block_until_ready((pool_d, loss, new_queue))
    assert pool_d.shape == (BATCH, HIDDEN)
    assert new_queue.shape == queue.shape
    assert bool(jnp.isfinite(loss))
    print("KERNEL_OK")
</pallas_src>

<mosaic_0001>
module attributes {stable_mosaic.version = 11 : i64} {
  func.func @kernel(%arg0: i32, %arg1: memref<2x8x128xf32, #tpu.memory_space<vmem>>, %arg2: memref<2x1x8xf32, #tpu.memory_space<vmem>>, %arg3: memref<1x128x384xbf16, #tpu.memory_space<vmem>>, %arg4: memref<1x1x384xf32, #tpu.memory_space<vmem>>, %arg5: memref<1x128x128xbf16, #tpu.memory_space<vmem>>, %arg6: memref<1x1x128xf32, #tpu.memory_space<vmem>>, %arg7: memref<1x1x128xf32, #tpu.memory_space<vmem>>, %arg8: memref<1x1x128xf32, #tpu.memory_space<vmem>>, %arg9: memref<1x128x256xbf16, #tpu.memory_space<vmem>>, %arg10: memref<1x1x256xf32, #tpu.memory_space<vmem>>, %arg11: memref<1x256x128xbf16, #tpu.memory_space<vmem>>, %arg12: memref<1x1x128xf32, #tpu.memory_space<vmem>>, %arg13: memref<1x1x128xf32, #tpu.memory_space<vmem>>, %arg14: memref<1x1x128xf32, #tpu.memory_space<vmem>>, %arg15: memref<1x128xf32, #tpu.memory_space<vmem>>, %arg16: memref<1x128xf32, #tpu.memory_space<vmem>>, %arg17: memref<128x128xbf16, #tpu.memory_space<vmem>>, %arg18: memref<1x128xf32, #tpu.memory_space<vmem>>, %arg19: memref<2x128xf32, #tpu.memory_space<vmem>>, %arg20: memref<2x8x128xf32, #tpu.memory_space<vmem>>) attributes {dimension_semantics = [#tpu.dimension_semantics<arbitrary>], iteration_bounds = array<i64: 2>, scalar_prefetch = 0 : i64, scratch_operands = 1 : i64, tpu.core_type = #tpu.core_type<tc>, window_params = [{pipeline_mode = #tpu.pipeline_mode<synchronous>, transform_indices = @transform_0, window_bounds = array<i64: 2, 8, 128>}, {pipeline_mode = #tpu.pipeline_mode<synchronous>, transform_indices = @transform_1, window_bounds = array<i64: 2, 1, 8>}, {transform_indices = @transform_2, window_bounds = array<i64: 1, 128, 384>}, {transform_indices = @transform_3, window_bounds = array<i64: 1, 1, 384>}, {transform_indices = @transform_4, window_bounds = array<i64: 1, 128, 128>}, {transform_indices = @transform_5, window_bounds = array<i64: 1, 1, 128>}, {transform_indices = @transform_6, window_bounds = array<i64: 1, 1, 128>}, {transform_indices = @transform_7, window_bounds = array<i64: 1, 1, 128>}, {transform_indices = @transform_8, window_bounds = array<i64: 1, 128, 256>}, {transform_indices = @transform_9, window_bounds = array<i64: 1, 1, 256>}, {transform_indices = @transform_10, window_bounds = array<i64: 1, 256, 128>}, {transform_indices = @transform_11, window_bounds = array<i64: 1, 1, 128>}, {transform_indices = @transform_12, window_bounds = array<i64: 1, 1, 128>}, {transform_indices = @transform_13, window_bounds = array<i64: 1, 1, 128>}, {pipeline_mode = #tpu.pipeline_mode<synchronous>, transform_indices = @transform_14, window_bounds = array<i64: 1, 128>}, {pipeline_mode = #tpu.pipeline_mode<synchronous>, transform_indices = @transform_15, window_bounds = array<i64: 1, 128>}, {pipeline_mode = #tpu.pipeline_mode<synchronous>, transform_indices = @transform_16, window_bounds = array<i64: 128, 128>}, {pipeline_mode = #tpu.pipeline_mode<synchronous>, transform_indices = @transform_17, window_bounds = array<i64: 1, 128>}, {pipeline_mode = #tpu.pipeline_mode<synchronous>, transform_indices = @transform_18, window_bounds = array<i64: 2, 128>}]} {
    %c0_i32 = arith.constant 0 : i32
    %0 = arith.cmpi eq, %arg0, %c0_i32 : i32
    %1 = arith.extui %0 : i1 to i32
    %c0_i32_0 = arith.constant 0 : i32
    %2 = arith.cmpi ne, %1, %c0_i32_0 : i32
    scf.if %2 {
      %c0_76 = arith.constant 0 : index
      %c0_77 = arith.constant 0 : index
      %c0_78 = arith.constant 0 : index
      %183 = vector.load %arg1[%c0_76, %c0_77, %c0_78] : memref<2x8x128xf32, #tpu.memory_space<vmem>>, vector<2x8x128xf32>
      %c0_79 = arith.constant 0 : index
      %c0_80 = arith.constant 0 : index
      %184 = vector.load %arg15[%c0_79, %c0_80] : memref<1x128xf32, #tpu.memory_space<vmem>>, vector<1x128xf32>
      %c0_81 = arith.constant 0 : index
      %c0_82 = arith.constant 0 : index
      %185 = vector.load %arg16[%c0_81, %c0_82] : memref<1x128xf32, #tpu.memory_space<vmem>>, vector<1x128xf32>
      %cst_83 = arith.constant dense<0.000000e+00> : vector<2x8xf32>
      %186 = vector.multi_reduction <add>, %183, %cst_83 [2] : vector<2x8x128xf32> to vector<2x8xf32>
      %187 = vector.shape_cast %186 : vector<2x8xf32> to vector<2x8x1xf32>
      %cst_84 = arith.constant 1.280000e+02 : f32
      %188 = vector.broadcast %cst_84 : f32 to vector<2x8x1xf32>
      %189 = arith.divf %187, %188 : vector<2x8x1xf32>
      %190 = vector.broadcast %189 : vector<2x8x1xf32> to vector<2x8x128xf32>
      %191 = arith.subf %183, %190 : vector<2x8x128xf32>
      %192 = arith.mulf %191, %191 : vector<2x8x128xf32>
      %cst_85 = arith.constant dense<0.000000e+00> : vector<2x8xf32>
      %193 = vector.multi_reduction <add>, %192, %cst_85 [2] : vector<2x8x128xf32> to vector<2x8xf32>
      %194 = vector.shape_cast %193 : vector<2x8xf32> to vector<2x8x1xf32>
      %cst_86 = arith.constant 1.280000e+02 : f32
      %195 = vector.broadcast %cst_86 : f32 to vector<2x8x1xf32>
      %196 = arith.divf %194, %195 : vector<2x8x1xf32>
      %197 = vector.broadcast %189 : vector<2x8x1xf32> to vector<2x8x128xf32>
      %198 = arith.subf %183, %197 : vector<2x8x128xf32>
      %cst_87 = arith.constant 9.99999996E-13 : f32
      %199 = vector.broadcast %cst_87 : f32 to vector<2x8x1xf32>
      %200 = arith.addf %196, %199 : vector<2x8x1xf32>
      %201 = math.rsqrt %200 : vector<2x8x1xf32>
      %202 = vector.broadcast %201 : vector<2x8x1xf32> to vector<2x8x128xf32>
      %203 = arith.mulf %198, %202 : vector<2x8x128xf32>
      %204 = vector.shape_cast %184 : vector<1x128xf32> to vector<1x1x128xf32>
      %205 = vector.broadcast %204 : vector<1x1x128xf32> to vector<2x8x128xf32>
      %206 = arith.mulf %203, %205 : vector<2x8x128xf32>
      %207 = vector.shape_cast %185 : vector<1x128xf32> to vector<1x1x128xf32>
      %208 = vector.broadcast %207 : vector<1x1x128xf32> to vector<2x8x128xf32>
      %209 = arith.addf %206, %208 : vector<2x8x128xf32>
      %c0_88 = arith.constant 0 : index
      %c0_89 = arith.constant 0 : index
      %c0_90 = arith.constant 0 : index
      %210 = vector.load %arg20[%c0_88, %c0_89, %c0_90] : memref<2x8x128xf32, #tpu.memory_space<vmem>>, vector<2x8x128xf32>
      tpu.vector_store %arg20[%c0_88, %c0_89, %c0_90], %209 {strides = array<i32>} : memref<2x8x128xf32, #tpu.memory_space<vmem>>, vector<2x8x128xf32>,
    } else {
    }
    %c0 = arith.constant 0 : index
    %c0_1 = arith.constant 0 : index
    %c0_2 = arith.constant 0 : index
    %3 = vector.load %arg20[%c0, %c0_1, %c0_2] : memref<2x8x128xf32, #tpu.memory_space<vmem>>, vector<2x8x128xf32>
    %4 = vector.shape_cast %3 : vector<2x8x128xf32> to vector<16x128xf32>
    %5 = arith.truncf %4 : vector<16x128xf32> to vector<16x128xbf16>
    %c0_3 = arith.constant 0 : index
    %c0_4 = arith.constant 0 : index
    %c0_5 = arith.constant 0 : index
    %6 = vector.load %arg3[%c0_3, %c0_4, %c0_5] : memref<1x128x384xbf16, #tpu.memory_space<vmem>>, vector<1x128x384xbf16>
    %7 = vector.shape_cast %6 : vector<1x128x384xbf16> to vector<128x384xbf16>
    %cst = arith.constant dense<0.000000e+00> : vector<16x384xf32>
    %8 = tpu.matmul %5, %7, %cst {dimension_numbers = #tpu.dot_dimension_numbers<[1], [0], [0], [1], [0, 0, 1, 1], [], []>} : vector<16x128xbf16>, vector<128x384xbf16>, vector<16x384xf32> -> vector<16x384xf32>
    %c0_6 = arith.constant 0 : index
    %c0_7 = arith.constant 0 : index
    %c0_8 = arith.constant 0 : index
    %9 = vector.load %arg4[%c0_6, %c0_7, %c0_8] : memref<1x1x384xf32, #tpu.memory_space<vmem>>, vector<1x1x384xf32>
    %10 = vector.shape_cast %9 : vector<1x1x384xf32> to vector<1x384xf32>
    %11 = vector.broadcast %10 : vector<1x384xf32> to vector<16x384xf32>
    %12 = arith.addf %8, %11 : vector<16x384xf32>
    %13 = vector.extract_strided_slice %12 {offsets = [0, 0], sizes = [16, 128], strides = [1, 1]} : vector<16x384xf32> to vector<16x128xf32>
    %14 = vector.shape_cast %13 : vector<16x128xf32> to vector<2x8x128xf32>
    %15 = vector.extract_strided_slice %12 {offsets = [0, 128], sizes = [16, 128], strides = [1, 1]} : vector<16x384xf32> to vector<16x128xf32>
    %16 = vector.shape_cast %15 : vector<16x128xf32> to vector<2x8x128xf32>
    %17 = vector.extract_strided_slice %12 {offsets = [0, 256], sizes = [16, 128], strides = [1, 1]} : vector<16x384xf32> to vector<16x128xf32>
    %18 = vector.shape_cast %17 : vector<16x128xf32> to vector<2x8x128xf32>
    %c0_9 = arith.constant 0 : index
    %c0_10 = arith.constant 0 : index
    %c0_11 = arith.constant 0 : index
    %19 = vector.load %arg2[%c0_9, %c0_10, %c0_11] : memref<2x1x8xf32, #tpu.memory_space<vmem>>, vector<2x1x8xf32>
    %20 = tpu.iota {dimensions = array<i32: 2>} : vector<1x1x128xi32>
    %cst_12 = arith.constant 0.000000e+00 : f32
    %21 = vector.broadcast %cst_12 : f32 to vector<2x8x128xf32>
    %c0_i32_13 = arith.constant 0 : i32
    %22 = vector.broadcast %c0_i32_13 : i32 to vector<1x1x128xi32>
    %23 = arith.cmpi sge, %20, %22 : vector<1x1x128xi32>
    %c64_i32 = arith.constant 64 : i32
    %24 = vector.broadcast %c64_i32 : i32 to vector<1x1x128xi32>
    %25 = arith.cmpi slt, %20, %24 : vector<1x1x128xi32>
    %26 = arith.andi %23, %25 : vector<1x1x128xi1>
    %27 = arith.extui %26 : vector<1x1x128xi1> to vector<1x1x128xi32>
    %28 = arith.sitofp %27 : vector<1x1x128xi32> to vector<1x1x128xf32>
    %29 = vector.broadcast %28 : vector<1x1x128xf32> to vector<2x8x128xf32>
    %30 = arith.mulf %14, %29 : vector<2x8x128xf32>
    %31 = arith.truncf %30 : vector<2x8x128xf32> to vector<2x8x128xbf16>
    %32 = arith.truncf %16 : vector<2x8x128xf32> to vector<2x8x128xbf16>
    "tpu.trace_start"() <{level = 10 : i32, message = "bqd,bkd->bqk"}> : () -> ()
    %cst_14 = arith.constant dense<0.000000e+00> : vector<2x8x8xf32>
    %33 = tpu.matmul %31, %32, %cst_14 {dimension_numbers = #tpu.dot_dimension_numbers<[2], [2], [1], [1], [0, 0, 0, 1, 1, 1], [0], [0]>} : vector<2x8x128xbf16>, vector<2x8x128xbf16>, vector<2x8x8xf32> -> vector<2x8x8xf32>
    "tpu.trace_stop"() : () -> ()
    %cst_15 = arith.constant 1.250000e-01 : f32
    %34 = vector.broadcast %cst_15 : f32 to vector<2x8x8xf32>
    %35 = arith.mulf %33, %34 : vector<2x8x8xf32>
    %36 = vector.broadcast %19 : vector<2x1x8xf32> to vector<2x8x8xf32>
    %37 = arith.addf %35, %36 : vector<2x8x8xf32>
    %cst_16 = arith.constant dense<0xFF800000> : vector<2x8xf32>
    %38 = vector.multi_reduction <maximumf>, %37, %cst_16 [2] : vector<2x8x8xf32> to vector<2x8xf32>
    %39 = vector.shape_cast %38 : vector<2x8xf32> to vector<2x8x1xf32>
    %40 = vector.broadcast %39 : vector<2x8x1xf32> to vector<2x8x8xf32>
    %41 = arith.subf %37, %40 : vector<2x8x8xf32>
    %42 = math.exp %41 : vector<2x8x8xf32>
    %cst_17 = arith.constant dense<0.000000e+00> : vector<2x8xf32>
    %43 = vector.multi_reduction <add>, %42, %cst_17 [2] : vector<2x8x8xf32> to vector<2x8xf32>
    %44 = vector.shape_cast %43 : vector<2x8xf32> to vector<2x8x1xf32>
    %45 = tpu.reciprocal %44 {approx = true} : vector<2x8x1xf32> -> vector<2x8x1xf32>
    %46 = vector.broadcast %45 : vector<2x8x1xf32> to vector<2x8x8xf32>
    %47 = arith.mulf %42, %46 : vector<2x8x8xf32>
    %48 = arith.truncf %47 : vector<2x8x8xf32> to vector<2x8x8xbf16>
    %49 = vector.broadcast %28 : vector<1x1x128xf32> to vector<2x8x128xf32>
    %50 = arith.mulf %18, %49 : vector<2x8x128xf32>
    %51 = arith.truncf %50 : vector<2x8x128xf32> to vector<2x8x128xbf16>
    "tpu.trace_start"() <{level = 10 : i32, message = "bqk,bkd->bqd"}> : () -> ()
    %cst_18 = arith.constant dense<0.000000e+00> : vector<2x8x128xf32>
    %52 = tpu.matmul %48, %51, %cst_18 {dimension_numbers = #tpu.dot_dimension_numbers<[2], [1], [1], [2], [0, 0, 0, 1, 1, 2], [0], [0]>} : vector<2x8x8xbf16>, vector<2x8x128xbf16>, vector<2x8x128xf32> -> vector<2x8x128xf32>
    "tpu.trace_stop"() : () -> ()
    %53 = arith.addf %21, %52 : vector<2x8x128xf32>
    %c64_i32_19 = arith.constant 64 : i32
    %54 = vector.broadcast %c64_i32_19 : i32 to vector<1x1x128xi32>
    %55 = arith.cmpi sge, %20, %54 : vector<1x1x128xi32>
    %c128_i32 = arith.constant 128 : i32
    %56 = vector.broadcast %c128_i32 : i32 to vector<1x1x128xi32>
    %57 = arith.cmpi slt, %20, %56 : vector<1x1x128xi32>
    %58 = arith.andi %55, %57 : vector<1x1x128xi1>
    %59 = arith.extui %58 : vector<1x1x128xi1> to vector<1x1x128xi32>
    %60 = arith.sitofp %59 : vector<1x1x128xi32> to vector<1x1x128xf32>
    %61 = vector.broadcast %60 : vector<1x1x128xf32> to vector<2x8x128xf32>
    %62 = arith.mulf %14, %61 : vector<2x8x128xf32>
    %63 = arith.truncf %62 : vector<2x8x128xf32> to vector<2x8x128xbf16>
    %64 = arith.truncf %16 : vector<2x8x128xf32> to vector<2x8x128xbf16>
    "tpu.trace_start"() <{level = 10 : i32, message = "bqd,bkd->bqk"}> : () -> ()
    %cst_20 = arith.constant dense<0.000000e+00> : vector<2x8x8xf32>
    %65 = tpu.matmul %63, %64, %cst_20 {dimension_numbers = #tpu.dot_dimension_numbers<[2], [2], [1], [1], [0, 0, 0, 1, 1, 1], [0], [0]>} : vector<2x8x128xbf16>, vector<2x8x128xbf16>, vector<2x8x8xf32> -> vector<2x8x8xf32>
    "tpu.trace_stop"() : () -> ()
    %cst_21 = arith.constant 1.250000e-01 : f32
    %66 = vector.broadcast %cst_21 : f32 to vector<2x8x8xf32>
    %67 = arith.mulf %65, %66 : vector<2x8x8xf32>
    %68 = vector.broadcast %19 : vector<2x1x8xf32> to vector<2x8x8xf32>
    %69 = arith.addf %67, %68 : vector<2x8x8xf32>
    %cst_22 = arith.constant dense<0xFF800000> : vector<2x8xf32>
    %70 = vector.multi_reduction <maximumf>, %69, %cst_22 [2] : vector<2x8x8xf32> to vector<2x8xf32>
    %71 = vector.shape_cast %70 : vector<2x8xf32> to vector<2x8x1xf32>
    %72 = vector.broadcast %71 : vector<2x8x1xf32> to vector<2x8x8xf32>
    %73 = arith.subf %69, %72 : vector<2x8x8xf32>
    %74 = math.exp %73 : vector<2x8x8xf32>
    %cst_23 = arith.constant dense<0.000000e+00> : vector<2x8xf32>
    %75 = vector.multi_reduction <add>, %74, %cst_23 [2] : vector<2x8x8xf32> to vector<2x8xf32>
    %76 = vector.shape_cast %75 : vector<2x8xf32> to vector<2x8x1xf32>
    %77 = tpu.reciprocal %76 {approx = true} : vector<2x8x1xf32> -> vector<2x8x1xf32>
    %78 = vector.broadcast %77 : vector<2x8x1xf32> to vector<2x8x8xf32>
    %79 = arith.mulf %74, %78 : vector<2x8x8xf32>
    %80 = arith.truncf %79 : vector<2x8x8xf32> to vector<2x8x8xbf16>
    %81 = vector.broadcast %60 : vector<1x1x128xf32> to vector<2x8x128xf32>
    %82 = arith.mulf %18, %81 : vector<2x8x128xf32>
    %83 = arith.truncf %82 : vector<2x8x128xf32> to vector<2x8x128xbf16>
    "tpu.trace_start"() <{level = 10 : i32, message = "bqk,bkd->bqd"}> : () -> ()
    %cst_24 = arith.constant dense<0.000000e+00> : vector<2x8x128xf32>
    %84 = tpu.matmul %80, %83, %cst_24 {dimension_numbers = #tpu.dot_dimension_numbers<[2], [1], [1], [2], [0, 0, 0, 1, 1, 2], [0], [0]>} : vector<2x8x8xbf16>, vector<2x8x128xbf16>, vector<2x8x128xf32> -> vector<2x8x128xf32>
    "tpu.trace_stop"() : () -> ()
    %85 = arith.addf %53, %84 : vector<2x8x128xf32>
    %86 = vector.shape_cast %85 : vector<2x8x128xf32> to vector<16x128xf32>
    %87 = arith.truncf %86 : vector<16x128xf32> to vector<16x128xbf16>
    %c0_25 = arith.constant 0 : index
    %c0_26 = arith.constant 0 : index
    %c0_27 = arith.constant 0 : index
    %88 = vector.load %arg5[%c0_25, %c0_26, %c0_27] : memref<1x128x128xbf16, #tpu.memory_space<vmem>>, vector<1x128x128xbf16>
    %89 = vector.shape_cast %88 : vector<1x128x128xbf16> to vector<128x128xbf16>
    %cst_28 = arith.constant dense<0.000000e+00> : vector<16x128xf32>
    %90 = tpu.matmul %87, %89, %cst_28 {dimension_numbers = #tpu.dot_dimension_numbers<[1], [0], [0], [1], [0, 0, 1, 1], [], []>} : vector<16x128xbf16>, vector<128x128xbf16>, vector<16x128xf32> -> vector<16x128xf32>
    %c0_29 = arith.constant 0 : index
    %c0_30 = arith.constant 0 : index
    %c0_31 = arith.constant 0 : index
    %91 = vector.load %arg6[%c0_29, %c0_30, %c0_31] : memref<1x1x128xf32, #tpu.memory_space<vmem>>, vector<1x1x128xf32>
    %92 = vector.shape_cast %91 : vector<1x1x128xf32> to vector<1x128xf32>
    %93 = vector.broadcast %92 : vector<1x128xf32> to vector<16x128xf32>
    %94 = arith.addf %90, %93 : vector<16x128xf32>
    %95 = arith.addf %4, %94 : vector<16x128xf32>
    %c0_32 = arith.constant 0 : index
    %c0_33 = arith.constant 0 : index
    %c0_34 = arith.constant 0 : index
    %96 = vector.load %arg7[%c0_32, %c0_33, %c0_34] : memref<1x1x128xf32, #tpu.memory_space<vmem>>, vector<1x1x128xf32>
    %97 = vector.shape_cast %96 : vector<1x1x128xf32> to vector<1x128xf32>
    %c0_35 = arith.constant 0 : index
    %c0_36 = arith.constant 0 : index
    %c0_37 = arith.constant 0 : index
    %98 = vector.load %arg8[%c0_35, %c0_36, %c0_37] : memref<1x1x128xf32, #tpu.memory_space<vmem>>, vector<1x1x128xf32>
    %99 = vector.shape_cast %98 : vector<1x1x128xf32> to vector<1x128xf32>
    %cst_38 = arith.constant dense<0.000000e+00> : vector<16xf32>
    %100 = vector.multi_reduction <add>, %95, %cst_38 [1] : vector<16x128xf32> to vector<16xf32>
    %101 = vector.shape_cast %100 : vector<16xf32> to vector<16x1xf32>
    %cst_39 = arith.constant 1.280000e+02 : f32
    %102 = vector.broadcast %cst_39 : f32 to vector<16x1xf32>
    %103 = arith.divf %101, %102 : vector<16x1xf32>
    %104 = vector.broadcast %103 : vector<16x1xf32> to vector<16x128xf32>
    %105 = arith.subf %95, %104 : vector<16x128xf32>
    %106 = arith.mulf %105, %105 : vector<16x128xf32>
    %cst_40 = arith.constant dense<0.000000e+00> : vector<16xf32>
    %107 = vector.multi_reduction <add>, %106, %cst_40 [1] : vector<16x128xf32> to vector<16xf32>
    %108 = vector.shape_cast %107 : vector<16xf32> to vector<16x1xf32>
    %cst_41 = arith.constant 1.280000e+02 : f32
    %109 = vector.broadcast %cst_41 : f32 to vector<16x1xf32>
    %110 = arith.divf %108, %109 : vector<16x1xf32>
    %111 = vector.broadcast %103 : vector<16x1xf32> to vector<16x128xf32>
    %112 = arith.subf %95, %111 : vector<16x128xf32>
    %cst_42 = arith.constant 9.99999996E-13 : f32
    %113 = vector.broadcast %cst_42 : f32 to vector<16x1xf32>
    %114 = arith.addf %110, %113 : vector<16x1xf32>
    %115 = math.rsqrt %114 : vector<16x1xf32>
    %116 = vector.broadcast %115 : vector<16x1xf32> to vector<16x128xf32>
    %117 = arith.mulf %112, %116 : vector<16x128xf32>
    %118 = vector.broadcast %97 : vector<1x128xf32> to vector<16x128xf32>
    %119 = arith.mulf %117, %118 : vector<16x128xf32>
    %120 = vector.broadcast %99 : vector<1x128xf32> to vector<16x128xf32>
    %121 = arith.addf %119, %120 : vector<16x128xf32>
    %122 = arith.truncf %121 : vector<16x128xf32> to vector<16x128xbf16>
    %c0_43 = arith.constant 0 : index
    %c0_44 = arith.constant 0 : index
    %c0_45 = arith.constant 0 : index
    %123 = vector.load %arg9[%c0_43, %c0_44, %c0_45] : memref<1x128x256xbf16, #tpu.memory_space<vmem>>, vector<1x128x256xbf16>
    %124 = vector.shape_cast %123 : vector<1x128x256xbf16> to vector<128x256xbf16>
    %cst_46 = arith.constant dense<0.000000e+00> : vector<16x256xf32>
    %125 = tpu.matmul %122, %124, %cst_46 {dimension_numbers = #tpu.dot_dimension_numbers<[1], [0], [0], [1], [0, 0, 1, 1], [], []>} : vector<16x128xbf16>, vector<128x256xbf16>, vector<16x256xf32> -> vector<16x256xf32>
    %c0_47 = arith.constant 0 : index
    %c0_48 = arith.constant 0 : index
    %c0_49 = arith.constant 0 : index
    %126 = vector.load %arg10[%c0_47, %c0_48, %c0_49] : memref<1x1x256xf32, #tpu.memory_space<vmem>>, vector<1x1x256xf32>
    %127 = vector.shape_cast %126 : vector<1x1x256xf32> to vector<1x256xf32>
    %128 = vector.broadcast %127 : vector<1x256xf32> to vector<16x256xf32>
    %129 = arith.addf %125, %128 : vector<16x256xf32>
    %130 = arith.mulf %129, %129 : vector<16x256xf32>
    %131 = arith.mulf %129, %130 : vector<16x256xf32>
    %cst_50 = arith.constant 4.471500e-02 : f32
    %132 = vector.broadcast %cst_50 : f32 to vector<16x256xf32>
    %133 = arith.mulf %132, %131 : vector<16x256xf32>
    %134 = arith.addf %129, %133 : vector<16x256xf32>
    %cst_51 = arith.constant 0.797884583 : f32
    %135 = vector.broadcast %cst_51 : f32 to vector<16x256xf32>
    %136 = arith.mulf %135, %134 : vector<16x256xf32>
    %137 = math.tanh %136 : vector<16x256xf32>
    %cst_52 = arith.constant 1.000000e+00 : f32
    %138 = vector.broadcast %cst_52 : f32 to vector<16x256xf32>
    %139 = arith.addf %138, %137 : vector<16x256xf32>
    %cst_53 = arith.constant 5.000000e-01 : f32
    %140 = vector.broadcast %cst_53 : f32 to vector<16x256xf32>
    %141 = arith.mulf %140, %139 : vector<16x256xf32>
    %142 = arith.mulf %129, %141 : vector<16x256xf32>
    %143 = arith.truncf %142 : vector<16x256xf32> to vector<16x256xbf16>
    %c0_54 = arith.constant 0 : index
    %c0_55 = arith.constant 0 : index
    %c0_56 = arith.constant 0 : index
    %144 = vector.load %arg11[%c0_54, %c0_55, %c0_56] : memref<1x256x128xbf16, #tpu.memory_space<vmem>>, vector<1x256x128xbf16>
    %145 = vector.shape_cast %144 : vector<1x256x128xbf16> to vector<256x128xbf16>
    %cst_57 = arith.constant dense<0.000000e+00> : vector<16x128xf32>
    %146 = tpu.matmul %143, %145, %cst_57 {dimension_numbers = #tpu.dot_dimension_numbers<[1], [0], [0], [1], [0, 0, 1, 1], [], []>} : vector<16x256xbf16>, vector<256x128xbf16>, vector<16x128xf32> -> vector<16x128xf32>
    %c0_58 = arith.constant 0 : index
    %c0_59 = arith.constant 0 : index
    %c0_60 = arith.constant 0 : index
    %147 = vector.load %arg12[%c0_58, %c0_59, %c0_60] : memref<1x1x128xf32, #tpu.memory_space<vmem>>, vector<1x1x128xf32>
    %148 = vector.shape_cast %147 : vector<1x1x128xf32> to vector<1x128xf32>
    %149 = vector.broadcast %148 : vector<1x128xf32> to vector<16x128xf32>
    %150 = arith.addf %146, %149 : vector<16x128xf32>
    %151 = arith.addf %121, %150 : vector<16x128xf32>
    %c0_61 = arith.constant 0 : index
    %c0_62 = arith.constant 0 : index
    %c0_63 = arith.constant 0 : index
    %152 = vector.load %arg13[%c0_61, %c0_62, %c0_63] : memref<1x1x128xf32, #tpu.memory_space<vmem>>, vector<1x1x128xf32>
    %153 = vector.shape_cast %152 : vector<1x1x128xf32> to vector<1x128xf32>
    %c0_64 = arith.constant 0 : index
    %c0_65 = arith.constant 0 : index
    %c0_66 = arith.constant 0 : index
    %154 = vector.load %arg14[%c0_64, %c0_65, %c0_66] : memref<1x1x128xf32, #tpu.memory_space<vmem>>, vector<1x1x128xf32>
    %155 = vector.shape_cast %154 : vector<1x1x128xf32> to vector<1x128xf32>
    %cst_67 = arith.constant dense<0.000000e+00> : vector<16xf32>
    %156 = vector.multi_reduction <add>, %151, %cst_67 [1] : vector<16x128xf32> to vector<16xf32>
    %157 = vector.shape_cast %156 : vector<16xf32> to vector<16x1xf32>
    %cst_68 = arith.constant 1.280000e+02 : f32
    %158 = vector.broadcast %cst_68 : f32 to vector<16x1xf32>
    %159 = arith.divf %157, %158 : vector<16x1xf32>
    %160 = vector.broadcast %159 : vector<16x1xf32> to vector<16x128xf32>
    %161 = arith.subf %151, %160 : vector<16x128xf32>
    %162 = arith.mulf %161, %161 : vector<16x128xf32>
    %cst_69 = arith.constant dense<0.000000e+00> : vector<16xf32>
    %163 = vector.multi_reduction <add>, %162, %cst_69 [1] : vector<16x128xf32> to vector<16xf32>
    %164 = vector.shape_cast %163 : vector<16xf32> to vector<16x1xf32>
    %cst_70 = arith.constant 1.280000e+02 : f32
    %165 = vector.broadcast %cst_70 : f32 to vector<16x1xf32>
    %166 = arith.divf %164, %165 : vector<16x1xf32>
    %167 = vector.broadcast %159 : vector<16x1xf32> to vector<16x128xf32>
    %168 = arith.subf %151, %167 : vector<16x128xf32>
    %cst_71 = arith.constant 9.99999996E-13 : f32
    %169 = vector.broadcast %cst_71 : f32 to vector<16x1xf32>
    %170 = arith.addf %166, %169 : vector<16x1xf32>
    %171 = math.rsqrt %170 : vector<16x1xf32>
    %172 = vector.broadcast %171 : vector<16x1xf32> to vector<16x128xf32>
    %173 = arith.mulf %168, %172 : vector<16x128xf32>
    %174 = vector.broadcast %153 : vector<1x128xf32> to vector<16x128xf32>
    %175 = arith.mulf %173, %174 : vector<16x128xf32>
    %176 = vector.broadcast %155 : vector<1x128xf32> to vector<16x128xf32>
    %177 = arith.addf %175, %176 : vector<16x128xf32>
    %178 = vector.shape_cast %177 : vector<16x128xf32> to vector<2x8x128xf32>
    %c0_72 = arith.constant 0 : index
    %c0_73 = arith.constant 0 : index
    %c0_74 = arith.constant 0 : index
    %179 = vector.load %arg20[%c0_72, %c0_73, %c0_74] : memref<2x8x128xf32, #tpu.memory_space<vmem>>, vector<2x8x128xf32>
    tpu.vector_store %arg20[%c0_72, %c0_73, %c0_74], %178 {strides = array<i32>} : memref<2x8x128xf32, #tpu.memory_space<vmem>>, vector<2x8x128xf32>,
    %c1_i32 = arith.constant 1 : i32
    %180 = arith.cmpi eq, %arg0, %c1_i32 : i32
    %181 = arith.extui %180 : i1 to i32
    %c0_i32_75 = arith.constant 0 : i32
    %182 = arith.cmpi ne, %181, %c0_i32_75 : i32
    scf.if %182 {
      %183 = vector.shape_cast %177 : vector<16x128xf32> to vector<2x8x128xf32>
      %cst_76 = arith.constant dense<0.000000e+00> : vector<2x128xf32>
      %184 = vector.multi_reduction <add>, %183, %cst_76 [1] : vector<2x8x128xf32> to vector<2x128xf32>
      %cst_77 = arith.constant 8.000000e+00 : f32
      %185 = vector.broadcast %cst_77 : f32 to vector<2x128xf32>
      %186 = arith.divf %184, %185 : vector<2x128xf32>
      %187 = arith.truncf %186 : vector<2x128xf32> to vector<2x128xbf16>
      %c0_78 = arith.constant 0 : index
      %c0_79 = arith.constant 0 : index
      %188 = vector.load %arg17[%c0_78, %c0_79] : memref<128x128xbf16, #tpu.memory_space<vmem>>, vector<128x128xbf16>
      %cst_80 = arith.constant dense<0.000000e+00> : vector<2x128xf32>
      %189 = tpu.matmul %187, %188, %cst_80 {dimension_numbers = #tpu.dot_dimension_numbers<[1], [0], [0], [1], [0, 0, 1, 1], [], []>} : vector<2x128xbf16>, vector<128x128xbf16>, vector<2x128xf32> -> vector<2x128xf32>
      %c0_81 = arith.constant 0 : index
      %c0_82 = arith.constant 0 : index
      %190 = vector.load %arg18[%c0_81, %c0_82] : memref<1x128xf32, #tpu.memory_space<vmem>>, vector<1x128xf32>
      %191 = vector.broadcast %190 : vector<1x128xf32> to vector<2x128xf32>
      %192 = arith.addf %189, %191 : vector<2x128xf32>
      %193 = math.tanh %192 : vector<2x128xf32>
      %c0_83 = arith.constant 0 : index
      %c0_84 = arith.constant 0 : index
      %194 = vector.load %arg19[%c0_83, %c0_84] : memref<2x128xf32, #tpu.memory_space<vmem>>, vector<2x128xf32>
      tpu.vector_store %arg19[%c0_83, %c0_84], %193 {strides = array<i32>} : memref<2x128xf32, #tpu.memory_space<vmem>>, vector<2x128xf32>,
    } else {
    }
    return
  }
  func.func @transform_0(%arg0: i32) -> (i32, i32, i32) {
    %c0_i32 = arith.constant 0 : i32
    %c0_i32_0 = arith.constant 0 : i32
    %c0_i32_1 = arith.constant 0 : i32
    %c0_i32_2 = arith.constant 0 : i32
    return %c0_i32, %c0_i32_0, %c0_i32_1 : i32, i32, i32
  }
  func.func @transform_1(%arg0: i32) -> (i32, i32, i32) {
    %c0_i32 = arith.constant 0 : i32
    %c0_i32_0 = arith.constant 0 : i32
    %c0_i32_1 = arith.constant 0 : i32
    %c0_i32_2 = arith.constant 0 : i32
    return %c0_i32, %c0_i32_0, %c0_i32_1 : i32, i32, i32
  }
  func.func @transform_2(%arg0: i32) -> (i32, i32, i32) {
    %c0_i32 = arith.constant 0 : i32
    %c0_i32_0 = arith.constant 0 : i32
    %c0_i32_1 = arith.constant 0 : i32
    return %arg0, %c0_i32, %c0_i32_0 : i32, i32, i32
  }
  func.func @transform_3(%arg0: i32) -> (i32, i32, i32) {
    %c0_i32 = arith.constant 0 : i32
    %c0_i32_0 = arith.constant 0 : i32
    %c0_i32_1 = arith.constant 0 : i32
    return %arg0, %c0_i32, %c0_i32_0 : i32, i32, i32
  }
  func.func @transform_4(%arg0: i32) -> (i32, i32, i32) {
    %c0_i32 = arith.constant 0 : i32
    %c0_i32_0 = arith.constant 0 : i32
    %c0_i32_1 = arith.constant 0 : i32
    return %arg0, %c0_i32, %c0_i32_0 : i32, i32, i32
  }
  func.func @transform_5(%arg0: i32) -> (i32, i32, i32) {
    %c0_i32 = arith.constant 0 : i32
    %c0_i32_0 = arith.constant 0 : i32
    %c0_i32_1 = arith.constant 0 : i32
    return %arg0, %c0_i32, %c0_i32_0 : i32, i32, i32
  }
  func.func @transform_6(%arg0: i32) -> (i32, i32, i32) {
    %c0_i32 = arith.constant 0 : i32
    %c0_i32_0 = arith.constant 0 : i32
    %c0_i32_1 = arith.constant 0 : i32
    return %arg0, %c0_i32, %c0_i32_0 : i32, i32, i32
  }
  func.func @transform_7(%arg0: i32) -> (i32, i32, i32) {
    %c0_i32 = arith.constant 0 : i32
    %c0_i32_0 = arith.constant 0 : i32
    %c0_i32_1 = arith.constant 0 : i32
    return %arg0, %c0_i32, %c0_i32_0 : i32, i32, i32
  }
  func.func @transform_8(%arg0: i32) -> (i32, i32, i32) {
    %c0_i32 = arith.constant 0 : i32
    %c0_i32_0 = arith.constant 0 : i32
    %c0_i32_1 = arith.constant 0 : i32
    return %arg0, %c0_i32, %c0_i32_0 : i32, i32, i32
  }
  func.func @transform_9(%arg0: i32) -> (i32, i32, i32) {
    %c0_i32 = arith.constant 0 : i32
    %c0_i32_0 = arith.constant 0 : i32
    %c0_i32_1 = arith.constant 0 : i32
    return %arg0, %c0_i32, %c0_i32_0 : i32, i32, i32
  }
  func.func @transform_10(%arg0: i32) -> (i32, i32, i32) {
    %c0_i32 = arith.constant 0 : i32
    %c0_i32_0 = arith.constant 0 : i32
    %c0_i32_1 = arith.constant 0 : i32
    return %arg0, %c0_i32, %c0_i32_0 : i32, i32, i32
  }
  func.func @transform_11(%arg0: i32) -> (i32, i32, i32) {
    %c0_i32 = arith.constant 0 : i32
    %c0_i32_0 = arith.constant 0 : i32
    %c0_i32_1 = arith.constant 0 : i32
    return %arg0, %c0_i32, %c0_i32_0 : i32, i32, i32
  }
  func.func @transform_12(%arg0: i32) -> (i32, i32, i32) {
    %c0_i32 = arith.constant 0 : i32
    %c0_i32_0 = arith.constant 0 : i32
    %c0_i32_1 = arith.constant 0 : i32
    return %arg0, %c0_i32, %c0_i32_0 : i32, i32, i32
  }
  func.func @transform_13(%arg0: i32) -> (i32, i32, i32) {
    %c0_i32 = arith.constant 0 : i32
    %c0_i32_0 = arith.constant 0 : i32
    %c0_i32_1 = arith.constant 0 : i32
    return %arg0, %c0_i32, %c0_i32_0 : i32, i32, i32
  }
  func.func @transform_14(%arg0: i32) -> (i32, i32) {
    %c0_i32 = arith.constant 0 : i32
    %c0_i32_0 = arith.constant 0 : i32
    %c0_i32_1 = arith.constant 0 : i32
    return %c0_i32, %c0_i32_0 : i32, i32
  }
  func.func @transform_15(%arg0: i32) -> (i32, i32) {
    %c0_i32 = arith.constant 0 : i32
    %c0_i32_0 = arith.constant 0 : i32
    %c0_i32_1 = arith.constant 0 : i32
    return %c0_i32, %c0_i32_0 : i32, i32
  }
  func.func @transform_16(%arg0: i32) -> (i32, i32) {
    %c0_i32 = arith.constant 0 : i32
    %c0_i32_0 = arith.constant 0 : i32
    %c0_i32_1 = arith.constant 0 : i32
    return %c0_i32, %c0_i32_0 : i32, i32
  }
  func.func @transform_17(%arg0: i32) -> (i32, i32) {
    %c0_i32 = arith.constant 0 : i32
    %c0_i32_0 = arith.constant 0 : i32
    %c0_i32_1 = arith.constant 0 : i32
    return %c0_i32, %c0_i32_0 : i32, i32
  }
  func.func @transform_18(%arg0: i32) -> (i32, i32) {
    %c0_i32 = arith.constant 0 : i32
    %c0_i32_0 = arith.constant 0 : i32
    %c0_i32_1 = arith.constant 0 : i32
    return %c0_i32, %c0_i32_0 : i32, i32
  }
}

</mosaic_0001>

<bundles_post_ra>
// kernel: bert_for_model_forward.1
= control target key start
LH: loop header
LB: loop body
LE: loop exit
PB: predicated region body
PF: predicated region fallthrough
CT: control target
= control target key end

     0   :  { %s3718_s0 = inlined_call_operand.vmem [shape: f32[2,8,128], index: 0, kind: input, shape index: {}]   ;;  %s3719_s1 = inlined_call_operand.vmem [shape: f32[2,1,8], index: 1, kind: input, shape index: {}]   ;;  %s3720_s2 = inlined_call_operand.hbm [shape: bf16[2,128,384], index: 2, kind: input, shape index: {}]   ;;  %s3721_s3 = inlined_call_operand.vmem [shape: f32[2,1,384], index: 3, kind: input, shape index: {}]   ;;  %s3722_s4 = inlined_call_operand.vmem [shape: bf16[2,128,128], index: 4, kind: input, shape index: {}]   ;;  %s3723_s5 = inlined_call_operand.vmem [shape: f32[2,1,128], index: 5, kind: input, shape index: {}]   ;;  %s3724_s6 = inlined_call_operand.vmem [shape: f32[2,1,128], index: 6, kind: input, shape index: {}]   ;;  %s3725_s7 = inlined_call_operand.vmem [shape: f32[2,1,128], index: 7, kind: input, shape index: {}]   ;;  %s3726_s8 = inlined_call_operand.hbm [shape: bf16[2,128,256], index: 8, kind: input, shape index: {}]   ;;  %s3727_s9 = inlined_call_operand.vmem [shape: f32[2,1,256], index: 9, kind: input, shape index: {}]   ;;  %s3728_s10 = inlined_call_operand.hbm [shape: bf16[2,256,128], index: 10, kind: input, shape index: {}]   ;;  %s3729_s11 = inlined_call_operand.vmem [shape: f32[2,1,128], index: 11, kind: input, shape index: {}]   ;;  %s3730_s12 = inlined_call_operand.vmem [shape: f32[2,1,128], index: 12, kind: input, shape index: {}]   ;;  %s3731_s13 = inlined_call_operand.vmem [shape: f32[2,1,128], index: 13, kind: input, shape index: {}]   ;;  %s3732_s14 = inlined_call_operand.vmem [shape: f32[1,128], index: 14, kind: input, shape index: {}]   ;;  %s3733_s15 = inlined_call_operand.vmem [shape: f32[1,128], index: 15, kind: input, shape index: {}]   ;;  %s3734_s16 = inlined_call_operand.vmem [shape: bf16[128,128], index: 16, kind: input, shape index: {}]   ;;  %s3735_s17 = inlined_call_operand.vmem [shape: f32[1,128], index: 17, kind: input, shape index: {}]   ;;  %s3736_s18 = inlined_call_operand.hbm [shape: f32[2,128], index: 18, kind: output, shape index: {}]  }
   0x1   :  { %3749 = sst [smem:[#allocation16_spill]] %s3718_s0 }
   0x2   :  { %3750 = sst [smem:[#allocation17_spill]] %s3719_s1 }
   0x3   :  { %3751 = sst [smem:[#allocation18_spill]] %s3720_s2 }
   0x4   :  { %3752 = sst [smem:[#allocation19_spill]] %s3721_s3 }
   0x5   :  { %3753 = sst [smem:[#allocation20_spill]] %s3722_s4 }
   0x6   :  { %3754 = sst [smem:[#allocation21_spill]] %s3726_s8 }
   0x7   :  { %3755 = sst [smem:[#allocation22_spill]] %s3728_s10 }
   0x8   :  { %3756 = sst [smem:[#allocation23_spill]] %s3731_s13 }
   0x9   :  { %3757 = sst [smem:[#allocation24_spill]] %s3732_s14 }
   0xa   :  { %3758 = sst [smem:[#allocation25_spill]] %s3733_s15 }
   0xb   :  { %3759 = sst [smem:[#allocation26_spill]] %s3734_s16 }
   0xc   :  { %3760 = sst [smem:[#allocation27_spill]] %s3735_s17 }
   0xd   :  { %3761 = sst [smem:[#allocation28_spill]] %s3736_s18 }
   0xe   :  { %23 = vsyncpa [#allocation4], 0 }
   0xf   :  { %25 = vsyncpa [#allocation4 + $0x1], 0 }
  0x10   :  { %26 = vsyncpa [#allocation7], 0 }
  0x11   :  { %28 = vsyncpa [#allocation7 + $0x1], 0 }
  0x12   :  { %29 = vsyncpa [#allocation5], 0  ;;  %s3217_s27 = smov 0   ;;  %s3219_s28 = smov 0  }
  0x13   :  { %s3221_s29 = smov 0   ;;  %s3223_s30 = smov 0  }
  0x14 LB: > { %3762 = sst [smem:[#allocation13_spill]] %s3101_s29  ;;  %s3236_s0 = sadd.s32 4294967295, %s3105_s30   ;;  %s3105_s30 = sphi %s3223_s30, %s3789_s30   ;;  %s3101_s29 = sphi %s3221_s29, %s3791_s29   ;;  %s3097_s28 = sphi %s3219_s28, %s3793_s28   ;;  %s3093_s27 = sphi %s3217_s27, %s3792_s27  }
  0x15   : > { %s3239_s19 = sadd.s32 1, %s3105_s30   ;;  %s84_s20 = sadd.s32 1, %s3101_s29 }
  0x16   : > { %3763 = sst [smem:[#allocation14_spill]] %s3239_s19  ;;  %s81_s1 = ssub.s32 %s3105_s30, %s3239_s19 }
  0x17   : > { %p82_p0 = scmp.eq.s32.totalorder %s81_s1, 0  ;;  %p91_p1 = scmp.ne.s32.totalorder %s3101_s29, %s3097_s28 }
  0x18   : > { %p92_p2 = scmp.eq.s32.totalorder %s3105_s30, 0  ;;  %p97_p3 = scmp.ne.s32.totalorder %s3097_s28, %s3093_s27 }
  0x19   : > { %s3249_s21 = scalar_select %p82_p0, %s3101_s29, %s84_s20  }
  0x1a   : > { %p93_p4 = por %p92_p2, %p91_p1  ;;  %p98_p5 = scmp.eq.s32.totalorder %s3236_s0, 0 }
  0x1b   : > { %3764 = sst [smem:[#allocation15_spill]] %s3249_s21  ;;  %p2774_p6 = scmp.lt.s32.totalorder %s3105_s30, 2 }
  0x1c   : > { %p3253_p7 = por %p98_p5, %p97_p3  ;;  %s3258_s2 = sand.u32 1, %s3101_s29  }
  0x1d   : > { %p3260_p8 = pnand %p2774_p6, %p93_p4  ;;  %s584_s24 = sand.u32 1, %s3105_s30  }
  0x1e   : > { %s3765_s22 = scalar_select %p3253_p7, 1, 0 }
  0x1f   : > { %s3744_s25 = sshll.u32 %s3258_s2, 7  ;;  %s3745_s26 = sshll.u32 %s3105_s30, 11 }
  0x20   : > { %s588_s27 = scalar_lea.vmem [#allocation6], %s3744_s25  ;;  %s3767_s8 = sld [smem:[#allocation21_spill]] }
  0x21   : > { %s595_s1 = sshll.u32 %s588_s27, 4  ;;  %s3278_s29 = scalar_lea.sflag [#allocation7], %s584_s24  ;;  %s3276_s1 = int_to_ptr.vmem [resolvable:$true] %s595_s1 }
  0x22   : > { %p3284_p10 = pneg %p3260_p8 }
  0x26   : > { %s3274_s19 = scalar_lea.hbm %s3767_s8, %s3745_s26  ;;  %s2952_s20 = scalar_lea.hbm %s3767_s8, 4096 }
  0x27   : > { %s2947_s18 = scalar_lea.hbm %s3274_s19, 2048  ;;  %p2953_p13 = scmp.lt.u32.totalorder %s3274_s19, %s3767_s8 }
  0x28   : > { %p2948_p9 = scmp.ne.s32.totalorder %s3274_s19, %s2947_s18  ;;  %p2954_p0 = scmp.lt.u32.totalorder %s2952_s20, %s2947_s18 }
  0x29   : > { %p2956_p2 = scmp.lt.u32.totalorder %s2947_s18, %s3274_s19 }
  0x2a   : > { %p2950_p11 = pnand %p3284_p10, %p2948_p9  ;;  %p2955_p1 = por %p2954_p0, %p2953_p13 }
  0x2c   : > { %p2951_p12 = pneg %p2950_p11  ;;  %p2957_p3 = por %p2956_p2, %p2955_p1 }
  0x2e   : > { %p2958_p4 = pnand %p2957_p3, %p2951_p12 }
  0x30   : > { %2961 = shalt.err (!%p2958_p4)
}
  0x31   : > { %s2962_s24 = scalar_lea.vmem %s3276_s1, 2048  ;;  %s3107_s21 = smov [#allocation6]  }
  0x32   : > { %p2963_p5 = scmp.ne.s32.totalorder %s3276_s1, %s2962_s24  ;;  %s2967_s27 = sshll.u32 %s3107_s21, 4  ;;  %s2968_s27 = int_to_ptr.vmem [resolvable:$false] %s2967_s27 }
  0x33   : > { %s2969_s17 = scalar_lea.vmem %s2968_s27, 4096  ;;  %p2970_p11 = scmp.lt.s32.totalorder %s3276_s1, %s2968_s27 }
  0x34   : > { %p2965_p6 = pnand %p2963_p5, %p3284_p10  ;;  %p2971_p7 = scmp.lt.s32.totalorder %s2969_s17, %s2962_s24 }
  0x36   : > { %p2966_p9 = pneg %p2965_p6  ;;  %p2972_p13 = por %p2971_p7, %p2970_p11 }
  0x38   : > { %p2973_p0 = pnand %p2972_p13, %p2966_p9 }
  0x3a   : > { %2976 = shalt.err (!%p2973_p0)
}
  0x3b   : > { %s3108_s18 = smov 128   ;;  %s3109_s26 = smov 8  }
  0x3c   : > { %2770 = dma.hbm_to_vmem [thread:$0]  (!%p3260_p8), %s3274_s19, 2048, %s3276_s1, %s3278_s29, %s3108_s18, %s3108_s18, %s3109_s26  }
  0x3d   : > { %s3769_s20 = sshll.u32 %s3105_s30, 11  ;;  %s3770_s10 = sld [smem:[#allocation22_spill]] }
  0x3e   : > { %s3771_s17 = sshll.u32 %s3258_s2, 7  ;;  %p2465_p7 = scmp.ge.s32.totalorder %s3105_s30, 1 }
  0x3f   : > { %s616_s8 = scalar_lea.vmem [#allocation8], %s3771_s17  ;;  %p649_p12 = scmp.lt.s32.totalorder %s3105_s30, 3 }
  0x40   : > { %s623_s16 = sshll.u32 %s616_s8, 4  ;;  %s2750_s15 = smul.u32 192, %s3258_s2  ;;  %s3318_s16 = int_to_ptr.vmem [resolvable:$true] %s623_s16 }
  0x41   : > { %p3322_p1 = pnand %p2465_p7, %p649_p12  ;;  %s2751_s19 = smul.u32 3072, %s3105_s30 }
  0x42   : > { %s3773_s26 = sld [smem:[#allocation18_spill]]  ;;  %s534_s8 = scalar_lea.vmem [#allocation3], %s2750_s15 }
  0x43   : > { %s3313_s27 = scalar_lea.hbm %s3770_s10, %s3769_s20  ;;  %s541_s20 = sshll.u32 %s534_s8, 4  ;;  %s3332_s20 = int_to_ptr.vmem [resolvable:$true] %s541_s20 }
  0x44   : > { %s3772_s14 = scalar_select %p3322_p1, 1, 0 }
  0x45   : > { %s531_s21 = scalar_lea.sflag [#allocation4], %s3258_s2 }
  0x48   : > { %s3330_s24 = scalar_lea.hbm %s3773_s26, %s2751_s19  ;;  %s2982_s1 = scalar_lea.hbm %s3773_s26, 6144 }
  0x49   : > { %s2977_s17 = scalar_lea.hbm %s3330_s24, 3072  ;;  %p2983_p5 = scmp.lt.u32.totalorder %s3330_s24, %s3773_s26 }
  0x4a   : > { %p2978_p2 = scmp.ne.s32.totalorder %s3330_s24, %s2977_s17  ;;  %p2984_p6 = scmp.lt.u32.totalorder %s2982_s1, %s2977_s17 }
  0x4b   : > { %p2986_p11 = scmp.lt.u32.totalorder %s2977_s17, %s3330_s24 }
  0x4c   : > { %p2980_p3 = pnand %p2978_p2, %p3284_p10  ;;  %p2985_p9 = por %p2984_p6, %p2983_p5 }
  0x4e   : > { %p2981_p4 = pneg %p2980_p3  ;;  %p2987_p13 = por %p2986_p11, %p2985_p9 }
  0x50   : > { %p2988_p0 = pnand %p2987_p13, %p2981_p4 }
  0x52   : > { %2991 = shalt.err (!%p2988_p0)
}
  0x53   : > { %s2992_s15 = scalar_lea.vmem %s3332_s20, 3072  ;;  %s3110_s13 = smov [#allocation3]  }
  0x54   : > { %p2993_p7 = scmp.ne.s32.totalorder %s3332_s20, %s2992_s15  ;;  %s2997_s8 = sshll.u32 %s3110_s13, 4  ;;  %s2998_s8 = int_to_ptr.vmem [resolvable:$false] %s2997_s8 }
  0x55   : > { %s2999_s30 = scalar_lea.vmem %s2998_s8, 6144  ;;  %p3000_p3 = scmp.lt.s32.totalorder %s3332_s20, %s2998_s8 }
  0x56   : > { %p2995_p12 = pnand %p2993_p7, %p3284_p10  ;;  %p3001_p1 = scmp.lt.s32.totalorder %s2999_s30, %s2992_s15 }
  0x58   : > { %p2996_p2 = pneg %p2995_p12  ;;  %p3002_p5 = por %p3001_p1, %p3000_p3 }
  0x5a   : > { %p3003_p6 = pnand %p3002_p5, %p2996_p2 }
  0x5c   : > { %3006 = shalt.err (!%p3003_p6)
}
  0x5d   : > { %s3111_s17 = smov 192   ;;  %s3112_s1 = smov 12  }
  0x5e   : > { %2767 = dma.hbm_to_vmem [thread:$0]  (!%p3260_p8), %s3330_s24, 3072, %s3332_s20, %s531_s21, %s3111_s17, %s3111_s17, %s3112_s1  }
  0x5f   : > { %s3007_s19 = scalar_lea.hbm %s3313_s27, 2048  ;;  %s3012_s13 = scalar_lea.hbm %s3770_s10, 4096 }
  0x60   : > { %p3008_p4 = scmp.ne.s32.totalorder %s3313_s27, %s3007_s19  ;;  %p3013_p11 = scmp.lt.u32.totalorder %s3313_s27, %s3770_s10 }
  0x61   : > { %p3014_p13 = scmp.lt.u32.totalorder %s3012_s13, %s3007_s19  ;;  %p3016_p7 = scmp.lt.u32.totalorder %s3007_s19, %s3313_s27 }
  0x62   : > { %p3010_p1 = pnand %p3008_p4, %p3284_p10 }
  0x63   : > { %p3015_p0 = por %p3014_p13, %p3013_p11 }
  0x64   : > { %p3011_p9 = pneg %p3010_p1 }
  0x65   : > { %p3017_p12 = por %p3016_p7, %p3015_p0 }
  0x67   : > { %p3018_p2 = pnand %p3017_p12, %p3011_p9 }
  0x69   : > { %3021 = shalt.err (!%p3018_p2)
}
  0x6a   : > { %s3022_s2 = scalar_lea.vmem %s3318_s16, 2048  ;;  %s3113_s24 = smov [#allocation8]  }
  0x6b   : > { %p3023_p3 = scmp.ne.s32.totalorder %s3318_s16, %s3022_s2  ;;  %s3027_s20 = sshll.u32 %s3113_s24, 4  ;;  %s3028_s20 = int_to_ptr.vmem [resolvable:$false] %s3027_s20 }
  0x6c   : > { %s3029_s21 = scalar_lea.vmem %s3028_s20, 4096  ;;  %p3030_p4 = scmp.lt.s32.totalorder %s3318_s16, %s3028_s20 }
  0x6d   : > { %p3025_p5 = pnand %p3023_p3, %p3284_p10  ;;  %p3031_p1 = scmp.lt.s32.totalorder %s3029_s21, %s3022_s2 }
  0x6f   : > { %p3026_p6 = pneg %p3025_p5  ;;  %p3032_p11 = por %p3031_p1, %p3030_p4 }
  0x71   : > { %p3033_p13 = pnand %p3032_p11, %p3026_p6 }
  0x73   : > { %3036 = shalt.err (!%p3033_p13)
}
  0x74   : > { %s3114_s17 = smov 64   ;;  %s3115_s1 = smov 4  }
  0x75   : > { %2773 = dma.hbm_to_vmem [thread:$0]  (!%p3260_p8), %s3313_s27, 2048, %s3318_s16, %s3278_s29, %s3114_s17, %s3114_s17, %s3115_s1  }
  0x76   : > { %p3774_p10 = scmp.ne.s32.totalorder %s3772_s14, 0 }
  0x77   : > { %s655_s25 = sand.u32 (!%p3774_p10), 1, %s3097_s28   ;;  %p3775_p9 = scmp.ne.s32.totalorder (!%p3774_p10), %s3765_s22, 0 }
  0x78   : > { %653 = sbr.rel (%p3774_p10) target bundleno = 3091 (0xc13), region = 92  ;;  %s656_s18 = scalar_lea.sflag (!%p3774_p10), [#allocation4], %s655_s25 }
  0x79   : > { %s2752_s19 = smul.u32 (!%p3774_p10), 192, %s655_s25 }
  0x7b   : > { %s3383_s15 = scalar_lea.vmem (!%p3774_p10), [#allocation3], %s2752_s19 }
  0x7f   : > { %3080 = dma.done.wait (%p3775_p9), %s656_s18, 3072  }
  0x80   : > { %3082 = vsyncadd (%p3775_p9), %s656_s18, 4294964224  ;;  %s664_s13 = sand.u32 1, %s3236_s0   ;;  %s2466_s23 = sshll.u32 %s655_s25, 7 }
  0x81   : > { %s665_s16 = scalar_lea.sflag [#allocation7], %s664_s13  ;;  %s3390_s29 = scalar_lea.vmem [#allocation6], %s2466_s23 }
  0x82   : > { %3084 = dma.done.wait (%p3775_p9), %s665_s16, 4096  }
  0x83   : > { %3086 = vsyncadd (%p3775_p9), %s665_s16, 4294963200  ;;  %p766_p8 = scmp.lt.s32.totalorder %s3236_s0, 1  ;;  %s3776_s4 = sld [smem:[#allocation20_spill]] }
  0x84   : > { %s3777_s3 = sld [smem:[#allocation19_spill]]  ;;  %s3778_s13 = sld [smem:[#allocation23_spill]] }
  0x85   : > { %s3398_s14 = scalar_select %p766_p8, %s3236_s0, 1 }
  0x86   : > { %s3442_s10 = scalar_lea.vmem [#allocation8], %s2466_s23  ;;  %p2471_p0 = scmp.ne.s32.totalorder %s3236_s0, 0 }
  0x87   : > { %s2753_s27 = smul.u32 3, %s3398_s14  ;;  %s2568_s8 = sshll.u32 %s3398_s14, 6 }
  0x88   : > { %s783_s26 = scalar_lea.vmem %s3725_s7, %s3398_s14  ;;  %s2470_s30 = sshll.u32 %s3398_s14, 1 }
  0x89   : > { %s3405_s22 = scalar_lea.vmem %s3776_s4, %s2568_s8  ;;  %s3428_s4 = scalar_lea.vmem %s3727_s9, %s2470_s30 }
  0x8a   : > { %s3414_s25 = scalar_lea.vmem %s3777_s3, %s2753_s27  ;;  %s790_s17 = scalar_lea.vmem %s3729_s11, %s3398_s14 }
  0x8b   : > { %s793_s21 = scalar_lea.vmem %s3730_s12, %s3398_s14  ;;  %s796_s3 = scalar_lea.vmem %s3778_s13, %s3398_s14 }
  0x8c   : > { %801 = sbr.rel (%p2471_p0) target bundleno = 463 (0x1cf), region = 108  ;;  %s3779_s8 = sld [smem:[#allocation16_spill]] (!%p2471_p0) }
  0x8d   : > { %s3780_s20 = sld [smem:[#allocation24_spill]] (!%p2471_p0)  ;;  %s3781_s19 = sld [smem:[#allocation25_spill]] (!%p2471_p0) }
  0x92   : > { %v802_v0 = vld [vmem:[%s3779_s8] sm:$0xff] (!%p2471_p0)  ;;  %v803_v1 = vld [vmem:[%s3779_s8 + $0x8] sm:$0xff] (!%p2471_p0) }
  0x93   : > { %806 = vadd.xlane.f32.xlu0 %v802_v0  ;;  %v2472_v17 = vld [vmem:[%s3780_s20] ss:$0 sm:$0xff] }
  0x94   : > { %v2473_v19 = vld [vmem:[%s3781_s19] ss:$0 sm:$0xff] }
  0x97   : > { %808 = vadd.xlane.f32.xlu0 %v803_v1 }
 0x120   : > { %v807_v2 = vpop.xlane.xlu0 %806 }
 0x121   : > { %v811_v3 = vmul.f32 0.0078125, %v807_v2 }
 0x123   : > { %v813_v4 = vsub.f32 %v802_v0, %v811_v3 }
 0x124   : > { %v809_v5 = vpop.xlane.xlu0 %808 }
 0x125   : > { %v812_v6 = vmul.f32 0.0078125, %v809_v5  ;;  %v815_v7 = vmul.f32 %v813_v4, %v813_v4 }
 0x127   : > { %v814_v8 = vsub.f32 %v803_v1, %v812_v6  ;;  %817 = vadd.xlane.f32.xlu1 %v815_v7 }
 0x129   : > { %v816_v9 = vmul.f32 %v814_v8, %v814_v8 }
 0x12b   : > { %819 = vadd.xlane.f32.xlu1 %v816_v9 }
 0x1b4   : > { %v818_v10 = vpop.xlane.xlu1 %817 }
 0x1b5   : > { %v821_v11 = vmul.f32 0.0078125, %v818_v10 }
 0x1b7   : > { %v823_v12 = vadd.f32 1e-12, %v821_v11 }
 0x1b8   : > { %v820_v13 = vpop.xlane.xlu1 %819 }
 0x1b9   : > { %2821 = vrsqrt.f32 %v823_v12  ;;  %v822_v14 = vmul.f32 0.0078125, %v820_v13 }
 0x1bb   : > { %v824_v15 = vadd.f32 1e-12, %v822_v14 }
 0x1bd   : > { %2823 = vrsqrt.f32 %v824_v15 }
 0x1c3   : > { %v2822_v16 = vpop.eup %2821 }
 0x1c4   : > { %v827_v18 = vmul.f32 %v2822_v16, %v813_v4 }
 0x1c6   : > { %v835_v20 = vmul.f32 %v2472_v17, %v827_v18 }
 0x1c7   : > { %v2824_v21 = vpop.eup %2823 }
 0x1c8   : > { %v843_v22 = vadd.f32 %v2473_v19, %v835_v20  ;;  %v828_v23 = vmul.f32 %v2824_v21, %v814_v8 }
 0x1ca   : > { %845 = vst [vmem:[#allocation2] sm:$0xff] %v843_v22  ;;  %v836_v24 = vmul.f32 %v2472_v17, %v828_v23 }
 0x1cc   : > { %v844_v25 = vadd.f32 %v2473_v19, %v836_v24 }
 0x1ce   : > { %846 = vst [vmem:[#allocation2 + $0x8] sm:$0xff] %v844_v25 }
 0x1cf PF: > { %v2825_v26 = vld [vmem:[%s3383_s15 + $0x4] ss:$12 sps:$4 sm:$0xff]   ;;  %v2827_v27 = vld [vmem:[%s3383_s15] ss:$12 sps:$4 sm:$0xff]   ;;  %v3116_v28 = vmov 0   ;;  %v3117_v29 = vmov 0.0   ;;  %v884_v55 = vlaneseq  ;;  %s3783_s23 = scalar_lea.vmem %s3723_s5, %s3398_s14  ;;  %s3784_s20 = scalar_lea.vmem %s3724_s6, %s3398_s14 }
 0x1d0   : > { %1059 = vmatprep.mubr.bf16.mxu0 %v3116_v28  ;;  %2634 = vmatprep.subr.bf16.mxu1 %v3117_v29  ;;  %v2828_v30 = vld [vmem:[%s3383_s15 + $0x1c] ss:$12 sps:$4 sm:$0xff]   ;;  %v2830_v31 = vld [vmem:[%s3383_s15 + $0x18] ss:$12 sps:$4 sm:$0xff]   ;;  %v2831_v32 = vld [vmem:[%s3383_s15 + $0x34] ss:$12 sps:$4 sm:$0xff]  }
 0x1d1   : > { %1027 = vmatprep.subr.bf16.mxu0 %v2825_v26  ;;  %v2833_v33 = vld [vmem:[%s3383_s15 + $0x30] ss:$12 sps:$4 sm:$0xff]   ;;  %v2834_v34 = vld [vmem:[%s3383_s15 + $0x4c] ss:$12 sps:$4 sm:$0xff]   ;;  %v2836_v35 = vld [vmem:[%s3383_s15 + $0x48] ss:$12 sps:$4 sm:$0xff]  }
 0x1d2   : > { %1028 = vmatpush1.bf16.msra.mxu0 %v2827_v27  ;;  %v2837_v36 = vld [vmem:[%s3383_s15 + $0x64] ss:$12 sps:$4 sm:$0xff]   ;;  %v2849_v37 = vld [vmem:[%s3383_s15 + $0x8] ss:$12 sps:$4 sm:$0xff]   ;;  %v2850_v38 = vld [vmem:[%s3383_s15 + $0x20] ss:$12 sps:$4 sm:$0xff]  }
 0x1d3   : > { %1029 = vmatprep.subr.bf16.mxu0 %v2828_v30  ;;  %2635 = vmatpush3.bf16.msra.mxu1 %v2849_v37  ;;  %v2839_v39 = vld [vmem:[%s3383_s15 + $0x60] ss:$12 sps:$4 sm:$0xff]   ;;  %v2840_v40 = vld [vmem:[%s3383_s15 + $0x7c] ss:$12 sps:$4 sm:$0xff]   ;;  %v2851_v41 = vld [vmem:[%s3383_s15 + $0x38] ss:$12 sps:$4 sm:$0xff]  }
 0x1d4   : > { %2636 = vmatprep.subr.bf16.mxu1 %v3117_v29  ;;  %v2842_v42 = vld [vmem:[%s3383_s15 + $0x78] ss:$12 sps:$4 sm:$0xff]   ;;  %v2843_v43 = vld [vmem:[%s3383_s15 + $0x94] ss:$12 sps:$4 sm:$0xff]   ;;  %v2852_v44 = vld [vmem:[%s3383_s15 + $0x50] ss:$12 sps:$4 sm:$0xff]  }
 0x1d5   : > { %v2845_v45 = vld [vmem:[%s3383_s15 + $0x90] ss:$12 sps:$4 sm:$0xff]   ;;  %v2846_v46 = vld [vmem:[%s3383_s15 + $0xac] ss:$12 sps:$4 sm:$0xff]   ;;  %v2853_v47 = vld [vmem:[%s3383_s15 + $0x68] ss:$12 sps:$4 sm:$0xff]  }
 0x1d6   : > { %1030 = vmatpush1.bf16.msra.mxu0 %v2830_v31  ;;  %v2848_v48 = vld [vmem:[%s3383_s15 + $0xa8] ss:$12 sps:$4 sm:$0xff]   ;;  %v3485_v50 = vld [vmem:[#allocation2 + $0x8] sm:$0xff]  ;;  %v2854_v51 = vld [vmem:[%s3383_s15 + $0x80] ss:$12 sps:$4 sm:$0xff]   ;;  %vm3118_vm0 = vmmov 0  }
 0x1d7   : > { %1031 = vmatprep.subr.bf16.mxu0 %v2831_v32  ;;  %2637 = vmatpush3.bf16.msra.mxu1 %v2850_v38  ;;  %v3483_v49 = vld [vmem:[#allocation2] sm:$0xff]  ;;  %v2855_v53 = vld [vmem:[%s3383_s15 + $0x98] ss:$12 sps:$4 sm:$0xff]   ;;  %v3504_v56 = vshrl.u32 %v884_v55, 7  ;;  %v1114_v60 = vand.u32 127, %v884_v55  ;;  %vm1375_vm3 = vcmask 1043456  }
 0x1d8   : > { %2638 = vmatprep.subr.bf16.mxu1 %v3117_v29  ;;  %v849_v52 = vpack.c.bf16 %v3485_v50, %v3483_v49  ;;  %v2856_v54 = vld [vmem:[%s3383_s15 + $0xb0] ss:$12 sps:$4 sm:$0xff]   ;;  %2650 = vmatprep.mubr.msk.bf16.mxu1 %vm3118_vm0, %v3117_v29  ;;  %s3782_s18 = sld [smem:[#allocation17_spill]]  ;;  %vm1222_vm4 = vcmask 64512   ;;  %p2552_p7 = scmp.ne.s32.totalorder %s3236_s0, 1 }
 0x1d9   : > { %v890_v57 = vsub.s32 1, %v3504_v56  ;;  %v882_v58 = vld [vmem:[%s3414_s25] sm:$0x7]  ;;  %v886_v59 = vsub.s32 0, %v3504_v56  ;;  %vm1116_vm1 = vcmp.lt.s32.totalorder %v1114_v60, 64  ;;  %vm1251_vm2 = vcmp.ge.s32.totalorder %v1114_v60, 64 }
 0x1da   : > { %1032 = vmatpush1.bf16.msra.mxu0 %v2833_v33  ;;  %v2498_v5 = vsel %vm1116_vm1, 1.0, %v3117_v29  ;;  %v2501_v14 = vsel %vm1251_vm2, 1.0, %v3117_v29  ;;  %v894_v19 = vsub.s32 2, %v3504_v56  ;;  %vm3120_vm5 = vmmov (!%p2552_p7), 0   ;;  %s3787_s19 = sld [smem:[#allocation27_spill]] (!%p2552_p7) }
 0x1db   : > { %1033 = vmatprep.subr.bf16.mxu0 %v2834_v34  ;;  %2639 = vmatpush3.bf16.msra.mxu1 %v2851_v41  ;;  %v891_v61 = vrot.slane %v882_v58, %v890_v57  ;;  %v887_v62 = vrot.slane %v882_v58, %v886_v59  ;;  %vm2171_vm6 = vcmask (!%p2552_p7), 1041409  }
 0x1dc   : > { %2640 = vmatprep.subr.bf16.mxu1 %v3117_v29  ;;  %v895_v20 = vrot.slane %v882_v58, %v894_v19 }
 0x1de   : > { %1034 = vmatpush1.bf16.msra.mxu0 %v2836_v35 }
 0x1df   : > { %1035 = vmatprep.subr.bf16.mxu0 %v2837_v36  ;;  %2641 = vmatpush3.bf16.msra.mxu1 %v2852_v44 }
 0x1e0   : > { %2642 = vmatprep.subr.bf16.mxu1 %v3117_v29 }
 0x1e2   : > { %1036 = vmatpush1.bf16.msra.mxu0 %v2839_v39 }
 0x1e3   : > { %1037 = vmatprep.subr.bf16.mxu0 %v2840_v40  ;;  %2643 = vmatpush3.bf16.msra.mxu1 %v2853_v47 }
 0x1e4   : > { %2644 = vmatprep.subr.bf16.mxu1 %v3117_v29 }
 0x1e6   : > { %1038 = vmatpush1.bf16.msra.mxu0 %v2842_v42  ;;  %v2499_v42 = vld [vmem:[%s3782_s18] ss:$0 sm:$0xff] }
 0x1e7   : > { %1039 = vmatprep.subr.bf16.mxu0 %v2843_v43  ;;  %2645 = vmatpush3.bf16.msra.mxu1 %v2854_v51 }
 0x1e8   : > { %2646 = vmatprep.subr.bf16.mxu1 %v3117_v29 }
 0x1ea   : > { %1040 = vmatpush1.bf16.msra.mxu0 %v2845_v45 }
 0x1eb   : > { %1041 = vmatprep.subr.bf16.mxu0 %v2846_v46  ;;  %2647 = vmatpush3.bf16.msra.mxu1 %v2855_v53 }
 0x1ec   : > { %2648 = vmatprep.subr.bf16.mxu1 %v3117_v29 }
 0x1ee   : > { %1042 = vmatpush1.bf16.msra.mxu0 %v2848_v48 }
 0x1ef   : > { %2678 = vmatprep.subr.bf16.mxu0 %v3117_v29  ;;  %2649 = vmatpush3.bf16.msra.mxu1 %v2856_v54 }
 0x1f0   : > { %2654 = vmatprep.subr.bf16.mxu1 %v3117_v29 }
 0x1f1   : > { %1060 = vmatmul.mubr.bf16.vlgmr.msra.gmra.mrb[0].mxu0 %v849_v52 }
 0x1f2   : > { %2680 = vmatprep.mubr.msk.bf16.mxu0 %vm3118_vm0, %v3117_v29  ;;  %2651 = vmatmul.mubr.bf16.vlgmr.msra.gmra.mrb[0].mxu1 %v849_v52  ;;  %v2500_v52 = vld [vmem:[%s3782_s18 + $0x1] ss:$0 sm:$0xff] }
 0x1f3   : > { %2656 = vmatprep.mubr.msk.bf16.mxu1 %vm3118_vm0, %v3117_v29 }
 0x2c4   : > { %v1061_v63 = vpop.f32.mrb[0].mxu0 }
 0x2c5   : > { %v1063_v0 = vpop.f32.mrb[1].mxu0  ;;  %v1062_v3 = vadd.f32 %v1061_v63, %v887_v62  ;;  %v1104_v21 = vpop.f32.mrb[0].mxu1 }
 0x2c6   : > { %v1064_v1 = vadd.f32 %v1063_v0, %v891_v61  ;;  %v1065_v2 = vpop.f32.mrb[2].mxu0  ;;  %v1105_v22 = vadd.f32 %v1104_v21, %v895_v20  ;;  %v2652_v23 = vpop.f32.mrb[1].mxu1 }
 0x2c7   : > { %v1067_v4 = vpop.f32.mrb[3].mxu0  ;;  %v1120_v7 = vmul.f32 %v2498_v5, %v1062_v3  ;;  %v1066_v10 = vadd.f32 %v1065_v2, %v887_v62  ;;  %v1256_v15 = vmul.f32 %v2501_v14, %v1062_v3  ;;  %v1107_v24 = vpop.f32.mrb[2].mxu1 }
 0x2c8   : > { %v1124_v6 = vpack.c.bf16 %v1064_v1, %v1064_v1  ;;  %v1068_v8 = vadd.f32 %v1067_v4, %v891_v61  ;;  %v1247_v25 = vmul.f32 %v2498_v5, %v1105_v22  ;;  %v1368_v26 = vmul.f32 %v2501_v14, %v1105_v22  ;;  %v2653_v30 = vpop.f32.mrb[3].mxu1 }
 0x2c9   : > { %v1122_v9 = vpack.c.bf16 %v1120_v7, %v1120_v7  ;;  %v1121_v12 = vmul.f32 %v2498_v5, %v1066_v10  ;;  %v1258_v16 = vpack.c.bf16 %v1256_v15, %v1256_v15  ;;  %v1257_v17 = vmul.f32 %v2501_v14, %v1066_v10 }
 0x2ca   : > { %2655 = vmatpush3.bf16.xpose.msra.mxu1 %v1124_v6  ;;  %v1125_v11 = vpack.c.bf16 %v1068_v8, %v1068_v8  ;;  %v1108_v27 = vadd.f32 %v1107_v24, %v895_v20  ;;  %v1249_v33 = vpack.c.bf16 %v1247_v25, %v1247_v25  ;;  %v1370_v34 = vpack.c.bf16 %v1368_v26, %v1368_v26 }
 0x2cb   : > { %2660 = vmatprep.subr.bf16.mxu1 %v3117_v29  ;;  %v1123_v13 = vpack.c.bf16 %v1121_v12, %v1121_v12  ;;  %v1259_v18 = vpack.c.bf16 %v1257_v17, %v1257_v17 }
 0x2cc   : > { %v1248_v31 = vmul.f32 %v2498_v5, %v1108_v27  ;;  %v1369_v32 = vmul.f32 %v2501_v14, %v1108_v27  ;;  %v1377_v37 = vsel %vm1375_vm3, %v1370_v34, 0  ;;  %v3528_v39 = vsel %vm1375_vm3, %v1249_v33, 0 }
 0x2cd   : > { %2679 = vmatpush3.bf16.msra.mxu0 %v1377_v37 }
 0x2ce   : > { %v1250_v35 = vpack.c.bf16 %v1248_v31, %v1248_v31  ;;  %v1371_v36 = vpack.c.bf16 %v1369_v32, %v1369_v32  ;;  %2690 = vmatprep.subr.bf16.mxu0 %v3117_v29 }
 0x2d0   : > { %v1423_v38 = vsel %vm1375_vm3, %v1371_v36, 0  ;;  %v3530_v40 = vsel %vm1375_vm3, %v1250_v35, 0 }
 0x2d1   : > { %2657 = vmatmul.mubr.bf16.vlgmr.msra.gmra.mrb[4].mxu1 %v1122_v9 }
 0x2d2   : > { %2661 = vmatpush3.bf16.xpose.msra.mxu1 %v1125_v11  ;;  %2662 = vmatprep.mubr.msk.bf16.mxu1 %vm3118_vm0, %v3117_v29 }
 0x2d3   : > { %2666 = vmatprep.subr.bf16.mxu1 %v3117_v29 }
 0x2d9   : > { %2663 = vmatmul.mubr.bf16.vlgmr.msra.gmra.mrb[8].mxu1 %v1123_v13 }
 0x2da   : > { %2667 = vmatpush3.bf16.xpose.msra.mxu1 %v1124_v6  ;;  %2668 = vmatprep.mubr.msk.bf16.mxu1 %vm3118_vm0, %v3117_v29 }
 0x2db   : > { %2672 = vmatprep.subr.bf16.mxu1 %v3117_v29 }
 0x2e1   : > { %2669 = vmatmul.mubr.bf16.vlgmr.msra.gmra.mrb[12].mxu1 %v1258_v16 }
 0x2e2   : > { %2673 = vmatpush3.bf16.xpose.msra.mxu1 %v1125_v11  ;;  %2674 = vmatprep.mubr.msk.bf16.mxu1 %vm3118_vm0, %v3117_v29 }
 0x2e3   : > { %2684 = vmatprep.subr.bf16.mxu1 %v3117_v29 }
 0x2e9   : > { %2675 = vmatmul.mubr.bf16.vlgmr.msra.gmra.mrb[16].mxu1 %v1259_v18 }
 0x2ea   : > { %2686 = vmatprep.mubr.msk.bf16.mxu1 %vm3118_vm0, %v3117_v29  ;;  %2685 = vmatpush3.bf16.msra.mxu1 %v1423_v38 }
 0x2eb   : > { %2696 = vmatprep.subr.bf16.mxu1 %v3117_v29 }
 0x3a4   : > { %v1160_v41 = vpop.f32.mrb[4].mxu1 }
 0x3a5   : > { %v1206_v43 = vmul.f32 0.125, %v1160_v41  ;;  %v2658_v44 = vpop.f32.mrb[5].mxu1 }
 0x3a6   : > { %v1163_v45 = vpop.f32.mrb[6].mxu1 }
 0x3a7   : > { %v2659_v46 = vpop.f32.mrb[7].mxu1  ;;  %v1220_v47 = vadd.f32 %v2499_v42, %v1206_v43 }
 0x3a9   : > { %v1223_v48 = vsel %vm1222_vm4, %v1220_v47, -inf }
 0x3aa   : > { %1224 = vmax.xlane.f32.xlu1 %v1223_v48 }
 0x3ac   : > { %v1200_v51 = vpop.f32.mrb[8].mxu1 }
 0x3ad   : > { %v1207_v53 = vmul.f32 0.125, %v1200_v51  ;;  %v2664_v54 = vpop.f32.mrb[9].mxu1 }
 0x3ae   : > { %v1203_v55 = vpop.f32.mrb[10].mxu1 }
 0x3af   : > { %v2665_v58 = vpop.f32.mrb[11].mxu1  ;;  %v1221_v60 = vadd.f32 %v2500_v52, %v1207_v53  ;;  %v2860_v55 = vld [vmem:[%s3405_s22 + $0x18] sm:$0xff]  }
 0x3b0   : > { %v2861_v58 = vld [vmem:[%s3405_s22 + $0x20] sm:$0xff]  }
 0x3b1   : > { %v1226_v61 = vsel %vm1222_vm4, %v1221_v60, -inf }
 0x3b2   : > { %1227 = vmax.xlane.f32.xlu1 %v1226_v61  ;;  %v2863_v61 = vld [vmem:[%s3405_s22 + $0x30] sm:$0xff]  }
 0x3b4   : > { %v1294_v62 = vpop.f32.mrb[12].mxu1 }
 0x3b5   : > { %v1340_v63 = vmul.f32 0.125, %v1294_v62  ;;  %v2670_v0 = vpop.f32.mrb[13].mxu1  ;;  %v2864_v62 = vld [vmem:[%s3405_s22 + $0x38] sm:$0xff]  }
 0x3b6   : > { %v1297_v1 = vpop.f32.mrb[14].mxu1 }
 0x3b7   : > { %v2671_v2 = vpop.f32.mrb[15].mxu1  ;;  %v1342_v3 = vadd.f32 %v2499_v42, %v1340_v63 }
 0x3b9   : > { %v1344_v4 = vsel %vm1222_vm4, %v1342_v3, -inf }
 0x3ba   : > { %1345 = vmax.xlane.f32.xlu0 %v1344_v4 }
 0x3bc   : > { %v1334_v5 = vpop.f32.mrb[16].mxu1 }
 0x3bd   : > { %v1341_v6 = vmul.f32 0.125, %v1334_v5  ;;  %v2676_v7 = vpop.f32.mrb[17].mxu1 }
 0x3be   : > { %v1337_v8 = vpop.f32.mrb[18].mxu1 }
 0x3bf   : > { %v2677_v9 = vpop.f32.mrb[19].mxu1  ;;  %v1343_v10 = vadd.f32 %v2500_v52, %v1341_v6  ;;  %v2858_v52 = vld [vmem:[%s3405_s22 + $0x8] sm:$0xff]  }
 0x3c1   : > { %v1347_v11 = vsel %vm1222_vm4, %v1343_v10, -inf }
 0x3c2   : > { %1348 = vmax.xlane.f32.xlu0 %v1347_v11 }
 0x437   : > { %v1225_v12 = vpop.xlane.xlu1 %1224 }
 0x438   : > { %v1229_v13 = vsub.f32 %v1220_v47, %v1225_v12 }
 0x43a   : > { %v1231_v16 = vmul.f32 1.442695, %v1229_v13 }
 0x43f   : > { %v1228_v18 = vpop.xlane.xlu1 %1227 }
 0x440   : > { %v1230_v19 = vsub.f32 %v1221_v60, %v1228_v18  ;;  %v2862_v60 = vld [vmem:[%s3405_s22 + $0x28] sm:$0xff]  }
 0x441   : > { %v2868_v18 = vld [vmem:[%s3390_s29 + $0x10] ss:$8 sps:$4 sm:$0xff]  }
 0x442   : > { %v1233_v22 = vmul.f32 1.442695, %v1230_v19 }
 0x447   : > { %v1346_v14 = vpop.xlane.xlu0 %1345 }
 0x448   : > { %v1350_v15 = vsub.f32 %v1342_v3, %v1346_v14 }
 0x44a   : > { %v1352_v17 = vmul.f32 1.442695, %v1350_v15  ;;  %v2865_v15 = vld [vmem:[%s3390_s29] ss:$8 sps:$4 sm:$0xff]  }
 0x44c   : > { %2905 = vpow2.f32 %v1352_v17  ;;  %v2870_v17 = vld [vmem:[%s3390_s29 + $0x14] ss:$8 sps:$4 sm:$0xff]  }
 0x44d   : > { %2907 = vpow2.f32 %v1231_v16  ;;  %v2867_v16 = vld [vmem:[%s3390_s29 + $0x4] ss:$8 sps:$4 sm:$0xff]  }
 0x44f   : > { %v1349_v20 = vpop.xlane.xlu0 %1348 }
 0x450   : > { %v1351_v21 = vsub.f32 %v1343_v10, %v1349_v20 }
 0x452   : > { %v1354_v23 = vmul.f32 1.442695, %v1351_v21 }
 0x454   : > { %2909 = vpow2.f32 %v1354_v23 }
 0x455   : > { %2911 = vpow2.f32 %v1233_v22 }
 0x456   : > { %v2906_v24 = vpop.eup %2905 }
 0x457   : > { %v1356_v25 = vsel %vm1222_vm4, %v2906_v24, 0.0  ;;  %v2908_v26 = vpop.eup %2907 }
 0x458   : > { %1357 = vadd.xlane.f32.xlu0 %v1356_v25  ;;  %v1235_v27 = vsel %vm1222_vm4, %v2908_v26, 0.0  ;;  %v2873_v25 = vld [vmem:[%s3390_s29 + $0x24] ss:$8 sps:$4 sm:$0xff]  }
 0x45c   : > { %1236 = vadd.xlane.f32.xlu0 %v1235_v27  ;;  %v2876_v27 = vld [vmem:[%s3390_s29 + $0x34] ss:$8 sps:$4 sm:$0xff]  }
 0x45e   : > { %v2910_v30 = vpop.eup %2909 }
 0x45f   : > { %v1359_v31 = vsel %vm1222_vm4, %v2910_v30, 0.0  ;;  %v2912_v32 = vpop.eup %2911 }
 0x460   : > { %1360 = vadd.xlane.f32.xlu1 %v1359_v31  ;;  %v1238_v33 = vsel %vm1222_vm4, %v2912_v32, 0.0  ;;  %v2879_v31 = vld [vmem:[%s3390_s29 + $0x44] ss:$8 sps:$4 sm:$0xff]  }
 0x464   : > { %1239 = vadd.xlane.f32.xlu1 %v1238_v33  ;;  %v2882_v33 = vld [vmem:[%s3390_s29 + $0x54] ss:$8 sps:$4 sm:$0xff]  }
 0x4e5   : > { %v1358_v34 = vpop.xlane.xlu0 %1357 }
 0x4e6   : > { %2913 = vrcp.f32 %v1358_v34  ;;  %v2880_v34 = vld [vmem:[%s3390_s29 + $0x50] ss:$8 sps:$4 sm:$0xff]  }
 0x4e9   : > { %v1237_v35 = vpop.xlane.xlu0 %1236 }
 0x4ea   : > { %2915 = vrcp.f32 %v1237_v35  ;;  %v2885_v35 = vld [vmem:[%s3390_s29 + $0x64] ss:$8 sps:$4 sm:$0xff]  }
 0x4ed   : > { %v1361_v36 = vpop.xlane.xlu1 %1360 }
 0x4ee   : > { %2917 = vrcp.f32 %v1361_v36  ;;  %v2883_v36 = vld [vmem:[%s3390_s29 + $0x60] ss:$8 sps:$4 sm:$0xff]  }
 0x4f0   : > { %v2914_v37 = vpop.eup %2913 }
 0x4f1   : > { %v1364_v38 = vmul.f32 %v2914_v37, %v2906_v24  ;;  %v1240_v41 = vpop.xlane.xlu1 %1239  ;;  %v2888_v37 = vld [vmem:[%s3390_s29 + $0x74] ss:$8 sps:$4 sm:$0xff]  }
 0x4f2   : > { %2919 = vrcp.f32 %v1240_v41 }
 0x4f3   : > { %v1366_v42 = vpack.c.bf16 %v1364_v38, %v1364_v38  ;;  %v2886_v38 = vld [vmem:[%s3390_s29 + $0x70] ss:$8 sps:$4 sm:$0xff]  }
 0x4f4   : > { %v2916_v43 = vpop.eup %2915 }
 0x4f5   : > { %2681 = vmatmul.mubr.msk.bf16.vlgmr.msra.gmra.mrb[4].mxu0 %vm1222_vm4, %v1366_v42  ;;  %v1243_v46 = vmul.f32 %v2916_v43, %v2908_v26  ;;  %v2871_v26 = vld [vmem:[%s3390_s29 + $0x20] ss:$8 sps:$4 sm:$0xff]  }
 0x4f6   : > { %2691 = vmatpush3.bf16.msra.mxu0 %v3528_v39  ;;  %2692 = vmatprep.mubr.msk.bf16.mxu0 %vm3118_vm0, %v3117_v29  ;;  %v2857_v39 = vld [vmem:[%s3405_s22] sm:$0xff]  }
 0x4f7   : > { %2702 = vmatprep.subr.bf16.mxu0 %v3117_v29  ;;  %v1245_v48 = vpack.c.bf16 %v1243_v46, %v1243_v46 }
 0x4f8   : > { %v2918_v44 = vpop.eup %2917 }
 0x4f9   : > { %v1365_v45 = vmul.f32 %v2918_v44, %v2910_v30  ;;  %v2874_v30 = vld [vmem:[%s3390_s29 + $0x30] ss:$8 sps:$4 sm:$0xff]  }
 0x4fb   : > { %v1367_v47 = vpack.c.bf16 %v1365_v45, %v1365_v45 }
 0x4fc   : > { %v2920_v51 = vpop.eup %2919 }
 0x4fd   : > { %2687 = vmatmul.mubr.msk.bf16.vlgmr.msra.gmra.mrb[20].mxu1 %vm1222_vm4, %v1367_v47  ;;  %v1244_v53 = vmul.f32 %v2920_v51, %v2912_v32  ;;  %v2877_v32 = vld [vmem:[%s3390_s29 + $0x40] ss:$8 sps:$4 sm:$0xff]  }
 0x4fe   : > { %2697 = vmatpush3.bf16.msra.mxu1 %v3530_v40  ;;  %2698 = vmatprep.mubr.msk.bf16.mxu1 %vm3118_vm0, %v3117_v29  ;;  %v2859_v40 = vld [vmem:[%s3405_s22 + $0x10] sm:$0xff]  }
 0x4ff   : > { %v1246_v54 = vpack.c.bf16 %v1244_v53, %v1244_v53  ;;  %1822 = vmatprep.subr.bf16.mxu1 %v2867_v16 }
 0x501   : > { %2693 = vmatmul.mubr.msk.bf16.vlgmr.msra.gmra.mrb[4].mxu0 %vm1222_vm4, %v1245_v48 }
 0x502   : > { %2703 = vmatpush3.bf16.msra.mxu0 %v2857_v39  ;;  %2718 = vmatprep.mubr.msk.bf16.mxu0 %vm3118_vm0, %v3117_v29  ;;  %v2515_v39 = vld [vmem:[%s3784_s20] ss:$0 sm:$0xff] }
 0x503   : > { %2704 = vmatprep.subr.bf16.mxu0 %v3117_v29 }
 0x506   : > { %2705 = vmatpush3.bf16.msra.mxu0 %v2858_v52 }
 0x507   : > { %2706 = vmatprep.subr.bf16.mxu0 %v3117_v29 }
 0x509   : > { %2699 = vmatmul.mubr.msk.bf16.vlgmr.msra.gmra.mrb[20].mxu1 %vm1222_vm4, %v1246_v54 }
 0x50a   : > { %2707 = vmatpush3.bf16.msra.mxu0 %v2859_v40  ;;  %1854 = vmatprep.mubr.bf16.mxu1 %v3116_v28  ;;  %v2516_v40 = vld [vmem:[%s783_s26] ss:$0 sm:$0xff] }
 0x50b   : > { %2708 = vmatprep.subr.bf16.mxu0 %v3117_v29  ;;  %1823 = vmatpush1.bf16.msra.mxu1 %v2865_v15 }
 0x50c   : > { %1824 = vmatprep.subr.bf16.mxu1 %v2870_v17 }
 0x50e   : > { %2709 = vmatpush3.bf16.msra.mxu0 %v2860_v55 }
 0x50f   : > { %2710 = vmatprep.subr.bf16.mxu0 %v3117_v29  ;;  %1825 = vmatpush1.bf16.msra.mxu1 %v2868_v18 }
 0x510   : > { %1826 = vmatprep.subr.bf16.mxu1 %v2873_v25 }
 0x512   : > { %2711 = vmatpush3.bf16.msra.mxu0 %v2861_v58 }
 0x513   : > { %2712 = vmatprep.subr.bf16.mxu0 %v3117_v29  ;;  %1827 = vmatpush1.bf16.msra.mxu1 %v2871_v26 }
 0x514   : > { %1828 = vmatprep.subr.bf16.mxu1 %v2876_v27 }
 0x516   : > { %2713 = vmatpush3.bf16.msra.mxu0 %v2862_v60 }
 0x517   : > { %2714 = vmatprep.subr.bf16.mxu0 %v3117_v29  ;;  %1829 = vmatpush1.bf16.msra.mxu1 %v2874_v30 }
 0x518   : > { %1830 = vmatprep.subr.bf16.mxu1 %v2879_v31 }
 0x51a   : > { %2715 = vmatpush3.bf16.msra.mxu0 %v2863_v61  ;;  %v2889_v61 = vld [vmem:[%s3442_s10 + $0x40] sm:$0xff]  }
 0x51b   : > { %2716 = vmatprep.subr.bf16.mxu0 %v3117_v29  ;;  %v2506_v29 = vld [vmem:[%s3783_s23] ss:$0 sm:$0xff]  ;;  %1831 = vmatpush1.bf16.msra.mxu1 %v2877_v32 }
 0x51c   : > { %1832 = vmatprep.subr.bf16.mxu1 %v2882_v33 }
 0x51e   : > { %2717 = vmatpush3.bf16.msra.mxu0 %v2864_v62  ;;  %v2890_v62 = vld [vmem:[%s3442_s10] sm:$0xff]  }
 0x51f   : > { %1833 = vmatpush1.bf16.msra.mxu1 %v2880_v34  ;;  %2603 = vmatprep.subr.bf16.mxu0 %v2889_v61 }
 0x520   : > { %1834 = vmatprep.subr.bf16.mxu1 %v2885_v35 }
 0x523   : > { %1835 = vmatpush1.bf16.msra.mxu1 %v2883_v36 }
 0x524   : > { %1836 = vmatprep.subr.bf16.mxu1 %v2888_v37 }
 0x527   : > { %1837 = vmatpush1.bf16.msra.mxu1 %v2886_v38 }
 0x5d4   : > { %v1505_v28 = vpop.f32.mrb[4].mxu0 }
 0x5d5   : > { %v2694_v63 = vpop.f32.mrb[5].mxu0 }
 0x5d6   : > { %v1508_v0 = vpop.f32.mrb[6].mxu0  ;;  %v2892_v63 = vld [vmem:[%s3442_s10 + $0x8] sm:$0xff]  }
 0x5d7   : > { %v2695_v1 = vpop.f32.mrb[7].mxu0  ;;  %v2893_v0 = vld [vmem:[%s3442_s10 + $0x50] sm:$0xff]  }
 0x5d8   : > { %v2894_v1 = vld [vmem:[%s3442_s10 + $0x10] sm:$0xff]  }
 0x5dc   : > { %v1551_v2 = vpop.f32.mrb[20].mxu1 }
 0x5dd   : > { %v1557_v3 = vpack.c.bf16 %v1551_v2, %v1505_v28  ;;  %v2700_v4 = vpop.f32.mrb[21].mxu1  ;;  %v2891_v28 = vld [vmem:[%s3442_s10 + $0x48] sm:$0xff]   ;;  %v2895_v2 = vld [vmem:[%s3442_s10 + $0x58] sm:$0xff]  }
 0x5de   : > { %v1554_v5 = vpop.f32.mrb[22].mxu1  ;;  %v2897_v4 = vld [vmem:[%s3442_s10 + $0x60] sm:$0xff]  }
 0x5df   : > { %v2701_v6 = vpop.f32.mrb[23].mxu1  ;;  %2719 = vmatmul.mubr.bf16.vlgmr.msra.gmra.mrb[8].mxu0 %v1557_v3  ;;  %v2896_v3 = vld [vmem:[%s3442_s10 + $0x18] sm:$0xff]   ;;  %v2898_v5 = vld [vmem:[%s3442_s10 + $0x20] sm:$0xff]  }
 0x5e0   : > { %2604 = vmatpush3.bf16.msra.mxu0 %v2890_v62  ;;  %v2899_v6 = vld [vmem:[%s3442_s10 + $0x68] sm:$0xff]  }
 0x5e1   : > { %2605 = vmatprep.subr.bf16.mxu0 %v2891_v28 }
 0x5e4   : > { %2606 = vmatpush3.bf16.msra.mxu0 %v2892_v63 }
 0x5e5   : > { %2607 = vmatprep.subr.bf16.mxu0 %v2893_v0  ;;  %v2533_v0 = vld [vmem:[%s790_s17] ss:$0 sm:$0xff] }
 0x5e8   : > { %2608 = vmatpush3.bf16.msra.mxu0 %v2894_v1 }
 0x5e9   : > { %2609 = vmatprep.subr.bf16.mxu0 %v2895_v2 }
 0x5ec   : > { %2610 = vmatpush3.bf16.msra.mxu0 %v2896_v3 }
 0x5ed   : > { %2611 = vmatprep.subr.bf16.mxu0 %v2897_v4 }
 0x5f0   : > { %2612 = vmatpush3.bf16.msra.mxu0 %v2898_v5 }
 0x5f1   : > { %2613 = vmatprep.subr.bf16.mxu0 %v2899_v6 }
 0x6b2   : > { %v1663_v7 = vpop.f32.mrb[8].mxu0 }
 0x6b3   : > { %v1664_v8 = vadd.f32 %v2506_v29, %v1663_v7  ;;  %v2720_v9 = vpop.f32.mrb[9].mxu0  ;;  %v2901_v7 = vld [vmem:[%s3442_s10 + $0x70] sm:$0xff]  }
 0x6b4   : > { %v1666_v10 = vpop.f32.mrb[10].mxu0  ;;  %v2903_v9 = vld [vmem:[%s3442_s10 + $0x78] sm:$0xff]  }
 0x6b5   : > { %v1667_v11 = vadd.f32 %v2506_v29, %v1666_v10  ;;  %v2721_v12 = vpop.f32.mrb[11].mxu0  ;;  %v1670_v13 = vadd.f32 %v1664_v8, %v3483_v49  ;;  %v2900_v29 = vld [vmem:[%s3442_s10 + $0x28] sm:$0xff]   ;;  %v2902_v8 = vld [vmem:[%s3442_s10 + $0x30] sm:$0xff]   ;;  %v2904_v10 = vld [vmem:[%s3442_s10 + $0x38] sm:$0xff]  }
 0x6b6   : > { %2614 = vmatpush3.bf16.msra.mxu0 %v2900_v29 }
 0x6b7   : > { %1674 = vadd.xlane.f32.xlu0 %v1670_v13  ;;  %v1671_v14 = vadd.f32 %v1667_v11, %v3485_v50  ;;  %2615 = vmatprep.subr.bf16.mxu0 %v2901_v7  ;;  %v1730_v11 = vld [vmem:[%s3428_s4] sm:$0x3] }
 0x6b8   : > { %v1735_v12 = vrot.slane %v1730_v11, %v886_v59 }
 0x6b9   : > { %1676 = vadd.xlane.f32.xlu1 %v1671_v14 }
 0x6ba   : > { %2616 = vmatpush3.bf16.msra.mxu0 %v2902_v8 }
 0x6bb   : > { %2617 = vmatprep.subr.bf16.mxu0 %v2903_v9 }
 0x6be   : > { %2618 = vmatpush3.bf16.msra.mxu0 %v2904_v10 }
 0x744   : > { %v1675_v19 = vpop.xlane.xlu0 %1674 }
 0x745   : > { %v1679_v20 = vmul.f32 0.0078125, %v1675_v19 }
 0x746   : > { %v1677_v21 = vpop.xlane.xlu1 %1676 }
 0x747   : > { %v1681_v49 = vsub.f32 %v1670_v13, %v1679_v20  ;;  %v1680_v50 = vmul.f32 0.0078125, %v1677_v21  ;;  %v1739_v13 = vrot.slane %v1730_v11, %v890_v57 }
 0x749   : > { %v1682_v22 = vsub.f32 %v1671_v14, %v1680_v50  ;;  %v1683_v23 = vmul.f32 %v1681_v49, %v1681_v49 }
 0x74b   : > { %1685 = vadd.xlane.f32.xlu0 %v1683_v23  ;;  %v1684_v24 = vmul.f32 %v1682_v22, %v1682_v22 }
 0x74d   : > { %1687 = vadd.xlane.f32.xlu1 %v1684_v24 }
 0x7d8   : > { %v1686_v41 = vpop.xlane.xlu0 %1685 }
 0x7d9   : > { %v1689_v42 = vmul.f32 0.0078125, %v1686_v41 }
 0x7da   : > { %v1688_v43 = vpop.xlane.xlu1 %1687 }
 0x7db   : > { %v1691_v44 = vadd.f32 1e-12, %v1689_v42  ;;  %v1690_v45 = vmul.f32 0.0078125, %v1688_v43 }
 0x7dd   : > { %2921 = vrsqrt.f32 %v1691_v44  ;;  %v1692_v46 = vadd.f32 1e-12, %v1690_v45 }
 0x7df   : > { %2923 = vrsqrt.f32 %v1692_v46 }
 0x7e7   : > { %v2922_v47 = vpop.eup %2921 }
 0x7e8   : > { %v1695_v48 = vmul.f32 %v2922_v47, %v1681_v49 }
 0x7e9   : > { %v2924_v51 = vpop.eup %2923 }
 0x7ea   : > { %v1696_v52 = vmul.f32 %v2924_v51, %v1682_v22  ;;  %v1703_v53 = vmul.f32 %v2515_v39, %v1695_v48 }
 0x7ec   : > { %v1704_v54 = vmul.f32 %v2515_v39, %v1696_v52  ;;  %v3610_v55 = vadd.f32 %v2516_v40, %v1703_v53 }
 0x7ee   : > { %v3612_v58 = vadd.f32 %v2516_v40, %v1704_v54 }
 0x7f0   : > { %v1713_v60 = vpack.c.bf16 %v3612_v58, %v3610_v55 }
 0x7f2   : > { %1855 = vmatmul.mubr.bf16.vlgmr.msra.gmra.mrb[24].mxu1 %v1713_v60 }
 0x8c5   : > { %v1856_v14 = vpop.f32.mrb[24].mxu1 }
 0x8c6   : > { %v1857_v15 = vadd.f32 %v1856_v14, %v1735_v12  ;;  %v1858_v16 = vpop.f32.mrb[25].mxu1 }
 0x8c7   : > { %v1859_v17 = vadd.f32 %v1858_v16, %v1739_v13  ;;  %v1860_v18 = vpop.f32.mrb[26].mxu1 }
 0x8c8   : > { %v1865_v19 = vmul.f32 %v1857_v15, %v1857_v15  ;;  %v1861_v20 = vadd.f32 %v1860_v18, %v1735_v12  ;;  %v1862_v21 = vpop.f32.mrb[27].mxu1 }
 0x8c9   : > { %v1866_v49 = vmul.f32 %v1859_v17, %v1859_v17  ;;  %v1863_v50 = vadd.f32 %v1862_v21, %v1739_v13 }
 0x8ca   : > { %v1869_v22 = vmul.f32 %v1865_v19, %v1857_v15  ;;  %v1867_v23 = vmul.f32 %v1861_v20, %v1861_v20 }
 0x8cb   : > { %v1870_v24 = vmul.f32 %v1866_v49, %v1859_v17  ;;  %v1868_v25 = vmul.f32 %v1863_v50, %v1863_v50  ;;  %v2550_v49 = vld [vmem:[%s793_s21] ss:$0 sm:$0xff]  ;;  %s3786_s21 = sld [smem:[#allocation26_spill]] (!%p2552_p7) }
 0x8cc   : > { %v1873_v26 = vmul.f32 0.044715, %v1869_v22  ;;  %v1871_v27 = vmul.f32 %v1867_v23, %v1861_v20  ;;  %v2551_v23 = vld [vmem:[%s796_s3] ss:$0 sm:$0xff] }
 0x8cd   : > { %v1874_v59 = vmul.f32 0.044715, %v1870_v24  ;;  %v1872_v30 = vmul.f32 %v1868_v25, %v1863_v50 }
 0x8ce   : > { %v1877_v56 = vadd.f32 %v1873_v26, %v1857_v15  ;;  %v1875_v57 = vmul.f32 0.044715, %v1871_v27 }
 0x8cf   : > { %v1878_v31 = vadd.f32 %v1874_v59, %v1859_v17  ;;  %v1876_v32 = vmul.f32 0.044715, %v1872_v30 }
 0x8d0   : > { %v1881_v33 = vmul.f32 0.7978846, %v1877_v56  ;;  %v1879_v34 = vadd.f32 %v1875_v57, %v1861_v20  ;;  %v3119_v56 = vmov (!%p2552_p7), 0.0  }
 0x8d1   : > { %v1882_v35 = vmul.f32 0.7978846, %v1878_v31  ;;  %v1880_v36 = vadd.f32 %v1876_v32, %v1863_v50  ;;  %v2937_v30 = vld [vmem:[%s3786_s21] sm:$0xff] (!%p2552_p7)   ;;  %2722 = vmatprep.subr.bf16.mxu0 (!%p2552_p7), %v3119_v56  ;;  %v2938_v57 = vld [vmem:[%s3786_s21 + $0x8] sm:$0xff] (!%p2552_p7)  }
 0x8d2   : > { %2925 = vtanh.f32 %v1881_v33  ;;  %v1883_v37 = vmul.f32 0.7978846, %v1879_v34 }
 0x8d3   : > { %2927 = vtanh.f32 %v1882_v35  ;;  %v1884_v38 = vmul.f32 0.7978846, %v1880_v36  ;;  %v2939_v35 = vld [vmem:[%s3786_s21 + $0x10] sm:$0xff] (!%p2552_p7)  }
 0x8d4   : > { %2929 = vtanh.f32 %v1883_v37 }
 0x8d5   : > { %2931 = vtanh.f32 %v1884_v38 }
 0x8dc   : > { %v2926_v41 = vpop.eup %2925 }
 0x8dd   : > { %v2928_v42 = vpop.eup %2927  ;;  %v1889_v43 = vadd.f32 1.0, %v2926_v41 }
 0x8de   : > { %v2930_v44 = vpop.eup %2929  ;;  %v1890_v45 = vadd.f32 1.0, %v2928_v42  ;;  %v2940_v42 = vld [vmem:[%s3786_s21 + $0x18] sm:$0xff] (!%p2552_p7)  }
 0x8df   : > { %v2932_v46 = vpop.eup %2931  ;;  %v1893_v47 = vmul.f32 0.5, %v1889_v43  ;;  %v1891_v39 = vadd.f32 1.0, %v2930_v44 }
 0x8e0   : > { %v1892_v48 = vadd.f32 1.0, %v2932_v46  ;;  %v1894_v51 = vmul.f32 0.5, %v1890_v45 }
 0x8e1   : > { %v1895_v52 = vmul.f32 0.5, %v1891_v39  ;;  %v1897_v40 = vmul.f32 %v1893_v47, %v1857_v15  ;;  %v2941_v47 = vld [vmem:[%s3786_s21 + $0x20] sm:$0xff] (!%p2552_p7)  }
 0x8e2   : > { %v1896_v53 = vmul.f32 0.5, %v1892_v48  ;;  %v1898_v60 = vmul.f32 %v1894_v51, %v1859_v17  ;;  %v2942_v51 = vld [vmem:[%s3786_s21 + $0x28] sm:$0xff] (!%p2552_p7)  }
 0x8e3   : > { %v1899_v54 = vmul.f32 %v1895_v52, %v1861_v20 }
 0x8e4   : > { %v1900_v61 = vmul.f32 %v1896_v53, %v1863_v50 }
 0x8e5   : > { %v1901_v62 = vpack.c.bf16 %v1899_v54, %v1897_v40  ;;  %v2943_v40 = vld [vmem:[%s3786_s21 + $0x30] sm:$0xff] (!%p2552_p7)  }
 0x8e6   : > { %v1902_v28 = vpack.c.bf16 %v1900_v61, %v1898_v60  ;;  %v2944_v61 = vld [vmem:[%s3786_s21 + $0x38] sm:$0xff] (!%p2552_p7)  }
 0x8e8   : > { %2070 = vmatprep.mubr.bf16.mxu0 %v1902_v28 }
 0x8e9   : > { %2071 = vmatmul.mubr.bf16.vlgmr.msra.gmra.mrb[12].mxu0 %v1901_v62 }
 0x8ea   : > { %2723 = vmatpush3.bf16.msra.mxu0 (!%p2552_p7), %v2937_v30  ;;  %2738 = vmatprep.mubr.msk.bf16.mxu0 (!%p2552_p7), %vm3120_vm5, %v3119_v56 }
 0x8eb   : > { %2724 = vmatprep.subr.bf16.mxu0 (!%p2552_p7), %v3119_v56 }
 0x8ee   : > { %2725 = vmatpush3.bf16.msra.mxu0 (!%p2552_p7), %v2938_v57 }
 0x8ef   : > { %2726 = vmatprep.subr.bf16.mxu0 (!%p2552_p7), %v3119_v56 }
 0x8f2   : > { %2727 = vmatpush3.bf16.msra.mxu0 (!%p2552_p7), %v2939_v35 }
 0x8f3   : > { %2728 = vmatprep.subr.bf16.mxu0 (!%p2552_p7), %v3119_v56 }
 0x8f6   : > { %2729 = vmatpush3.bf16.msra.mxu0 (!%p2552_p7), %v2940_v42 }
 0x8f7   : > { %2730 = vmatprep.subr.bf16.mxu0 (!%p2552_p7), %v3119_v56 }
 0x8fa   : > { %2731 = vmatpush3.bf16.msra.mxu0 (!%p2552_p7), %v2941_v47 }
 0x8fb   : > { %2732 = vmatprep.subr.bf16.mxu0 (!%p2552_p7), %v3119_v56 }
 0x8fe   : > { %2733 = vmatpush3.bf16.msra.mxu0 (!%p2552_p7), %v2942_v51 }
 0x8ff   : > { %2734 = vmatprep.subr.bf16.mxu0 (!%p2552_p7), %v3119_v56 }
 0x902   : > { %2735 = vmatpush3.bf16.msra.mxu0 (!%p2552_p7), %v2943_v40 }
 0x903   : > { %2736 = vmatprep.subr.bf16.mxu0 (!%p2552_p7), %v3119_v56 }
 0x906   : > { %2737 = vmatpush3.bf16.msra.mxu0 (!%p2552_p7), %v2944_v61 }
 0x9bc   : > { %v2619_v63 = vpop.f32.mrb[12].mxu0 }
 0x9bd   : > { %v2620_v1 = vpop.f32.mrb[13].mxu0 }
 0x9be   : > { %v2621_v2 = vadd.f32 %v2620_v1, %v2619_v63  ;;  %v2622_v3 = vpop.f32.mrb[14].mxu0  ;;  %v2553_v63 = vld [vmem:[%s3787_s19] ss:$0 sm:$0xff] (!%p2552_p7) }
 0x9bf   : > { %v2623_v4 = vpop.f32.mrb[15].mxu0 }
 0x9c0   : > { %v2073_v5 = vadd.f32 %v2621_v2, %v2533_v0  ;;  %v2624_v6 = vadd.f32 %v2623_v4, %v2622_v3 }
 0x9c2   : > { %v2076_v29 = vadd.f32 %v2624_v6, %v2533_v0  ;;  %v2079_v7 = vadd.f32 %v2073_v5, %v3610_v55 }
 0x9c4   : > { %2083 = vadd.xlane.f32.xlu0 %v2079_v7  ;;  %v2080_v8 = vadd.f32 %v2076_v29, %v3612_v58 }
 0x9c6   : > { %2085 = vadd.xlane.f32.xlu1 %v2080_v8 }
 0xa51   : > { %v2084_v9 = vpop.xlane.xlu0 %2083 }
 0xa52   : > { %v2087_v10 = vmul.f32 0.0078125, %v2084_v9 }
 0xa53   : > { %v2086_v11 = vpop.xlane.xlu1 %2085 }
 0xa54   : > { %v2089_v12 = vsub.f32 %v2079_v7, %v2087_v10  ;;  %v2088_v13 = vmul.f32 0.0078125, %v2086_v11 }
 0xa56   : > { %v2090_v14 = vsub.f32 %v2080_v8, %v2088_v13  ;;  %v2091_v15 = vmul.f32 %v2089_v12, %v2089_v12 }
 0xa58   : > { %2093 = vadd.xlane.f32.xlu0 %v2091_v15  ;;  %v2092_v16 = vmul.f32 %v2090_v14, %v2090_v14 }
 0xa5a   : > { %2095 = vadd.xlane.f32.xlu1 %v2092_v16 }
 0xae5   : > { %v2094_v17 = vpop.xlane.xlu0 %2093 }
 0xae6   : > { %v2097_v18 = vmul.f32 0.0078125, %v2094_v17 }
 0xae7   : > { %v2096_v19 = vpop.xlane.xlu1 %2095 }
 0xae8   : > { %v2099_v55 = vadd.f32 1e-12, %v2097_v18  ;;  %v2098_v20 = vmul.f32 0.0078125, %v2096_v19 }
 0xaea   : > { %2933 = vrsqrt.f32 %v2099_v55  ;;  %v2100_v58 = vadd.f32 1e-12, %v2098_v20 }
 0xaec   : > { %2935 = vrsqrt.f32 %v2100_v58 }
 0xaf4   : > { %v2934_v21 = vpop.eup %2933 }
 0xaf5   : > { %v2103_v50 = vmul.f32 %v2934_v21, %v2089_v12 }
 0xaf6   : > { %v2936_v22 = vpop.eup %2935 }
 0xaf7   : > { %v2111_v24 = vmul.f32 %v2550_v49, %v2103_v50  ;;  %v2104_v25 = vmul.f32 %v2936_v22, %v2090_v14  ;;  %2126 = sbr.rel (%p2552_p7) target bundleno = 3060 (0xbf4), region = 112 }
 0xaf9   : > { %v2119_v26 = vadd.f32 %v2551_v23, %v2111_v24  ;;  %v2112_v27 = vmul.f32 %v2550_v49, %v2104_v25 }
 0xafb   : > { %2121 = vst [vmem:[#allocation2] sm:$0xff] %v2119_v26  ;;  %v2120_v59 = vadd.f32 %v2551_v23, %v2112_v27  ;;  %v2127_v31 = vrot.slane (!%p2552_p7), %v2119_v26, 4 }
 0xafd   : > { %2122 = vst [vmem:[#allocation2 + $0x8] sm:$0xff] %v2120_v59  ;;  %v2133_v32 = vrot.slane (!%p2552_p7), %v2120_v59, 4  ;;  %v2128_v33 = vadd.f32 (!%p2552_p7), %v2127_v31, %v2119_v26 }
 0xaff   : > { %v2134_v34 = vadd.f32 %v2133_v32, %v2120_v59  ;;  %v2129_v36 = vrot.slane %v2128_v33, 2 }
 0xb01   : > { %v2135_v37 = vrot.slane %v2134_v34, 2  ;;  %v2130_v38 = vadd.f32 %v2129_v36, %v2128_v33 }
 0xb03   : > { %v2136_v41 = vadd.f32 %v2135_v37, %v2134_v34  ;;  %v2131_v43 = vrot.slane %v2130_v38, 1 }
 0xb05   : > { %v2137_v44 = vrot.slane %v2136_v41, 1  ;;  %v2132_v45 = vadd.f32 %v2131_v43, %v2130_v38 }
 0xb07   : > { %v2138_v46 = vadd.f32 %v2137_v44, %v2136_v41  ;;  %v2140_v39 = vmul.f32 0.125, %v2132_v45 }
 0xb09   : > { %v2141_v48 = vmul.f32 0.125, %v2138_v46  ;;  %v2142_v52 = vpack.c.bf16 %v2140_v39, %v2140_v39 }
 0xb0b   : > { %v2143_v53 = vpack.c.bf16 %v2141_v48, %v2141_v48  ;;  %v2169_v54 = vunpack.c.l.b16 %v2142_v52 }
 0xb0d   : > { %v2170_v60 = vunpack.c.l.b16 %v2143_v53 }
 0xb0f   : > { %v2172_v62 = vsel %vm2171_vm6, %v2170_v60, %v2169_v54 }
 0xb10   : > { %v2173_v28 = vpack.c.b16 %v2172_v62, %v2172_v62 }
 0xb12   : > { %2739 = vmatmul.mubr.bf16.vlgmr.msra.gmra.mrb[0].mxu0 %v2173_v28 }
 0xbe5   : > { %v2257_v0 = vpop.f32.mrb[0].mxu0 }
 0xbe6   : > { %v2258_v1 = vadd.f32 %v2553_v63, %v2257_v0  ;;  %v2740_v2 = vpop.f32.mrb[1].mxu0 }
 0xbe7   : > { %v2260_v3 = vpop.f32.mrb[2].mxu0 }
 0xbe8   : > { %2945 = vtanh.f32 %v2258_v1  ;;  %v2741_v4 = vpop.f32.mrb[3].mxu0 }
 0xbf2   : > { %v2946_v5 = vpop.eup %2945 }
 0xbf3   : > { %2264 = vst [vmem:[#allocation9] sm:$0x3] %v2946_v5 }
 0xbf4 PF: > { %p2775_p12 = scmp.eq.s32.totalorder %s3236_s0, 1  ;;  %s3121_s15 = smov [#allocation9]  }
 0xbf5   : > { %s2272_s25 = sshll.u32 %s3121_s15, 4  ;;  %s2273_s25 = int_to_ptr.vmem [resolvable:$true] %s2272_s25 }
 0xbf6   : > { %s3037_s16 = scalar_lea.vmem %s2273_s25, 32  ;;  %p3044_p6 = scmp.lt.s32.totalorder %s2273_s25, %s2273_s25 }
 0xbf7   : > { %p3038_p2 = scmp.ne.s32.totalorder %s2273_s25, %s3037_s16  ;;  %p3045_p4 = scmp.lt.s32.totalorder %s3037_s16, %s3037_s16 }
 0xbf9   : > { %p3039_p3 = pnand %p3038_p2, %p2775_p12  ;;  %p3046_p1 = por %p3045_p4, %p3044_p6 }
 0xbfb   : > { %p3040_p5 = pneg %p3039_p3 }
 0xbfd   : > { %p3047_p11 = pnand %p3046_p1, %p3040_p5 }
 0xbff   : > { %3050 = shalt.err (!%p3047_p11)
}
 0xc00   : > { %s3788_s3 = sld [smem:[#allocation28_spill]] }
 0xc06   : > { %s3051_s2 = scalar_lea.hbm %s3788_s3, 32 }
 0xc07   : > { %p3052_p13 = scmp.ne.s32.totalorder %s3788_s3, %s3051_s2  ;;  %p3057_p8 = scmp.lt.u32.totalorder %s3051_s2, %s3788_s3 }
 0xc09   : > { %p3053_p10 = pnand %p3052_p13, %p2775_p12 }
 0xc0b   : > { %p3054_p9 = pneg %p3053_p10 }
 0xc0d   : > { %p3059_p0 = pnand %p3057_p8, %p3054_p9 }
 0xc0f   : > { %3062 = shalt.err (!%p3059_p0)
}
 0xc10   : > { %2761 = dma.vmem_to_hbm [thread:$0]  (%p2775_p12), %s2273_s25, 32, %s3788_s3, [#allocation5]  }
 0xc11   : > { %3088 = dma.done.wait (%p2775_p12), [#allocation5], 32  }
 0xc12   : > { %3090 = vsyncadd (%p2775_p12), [#allocation5], 4294967264 }
 0xc13 PF: > { %s3789_s30 = sld [smem:[#allocation14_spill]]  ;;  %s3790_s4 = sld [smem:[#allocation13_spill]] }
 0xc14   : > { %s3791_s29 = sld [smem:[#allocation15_spill]]  ;;  %s3792_s27 = smov %s3097_s28 }
 0xc19   : > { %p32_p7 = scmp.ge.s32.totalorder %s3789_s30, 4   ;;  %s3793_s28 = smov %s3790_s4 }
 0xc1b   :  { %34 = sbr.rel (!%p32_p7) target bundleno = 20 (0x14), region = 188 }
 0xc22   :  { %2285 = vsyncpa [#allocation4], 1 }
 0xc23   :  { %2287 = vsyncpa [#allocation4 + $0x1], 1 }
 0xc24   :  { %2288 = vsyncpa [#allocation7], 1 }
 0xc25   :  { %2290 = vsyncpa [#allocation7 + $0x1], 1 }
 0xc26   :  { %2291 = vsyncpa [#allocation5], 1 }
 0xc27   :  { %2293 = vsyncpa [#allocation5 + $0x1], 1 }

</bundles_post_ra>
